<compile_context>
chip_gen: v7x
topology: tpu7x:2x2x1
jax: 0.10.0
libtpu: 0.0.40
codegen_flags: <defaults>
</compile_context>

<pallas_src>
import math

import jax
import jax.numpy as jnp
from jax import lax
from jax.experimental import pallas as pl
from jax.experimental.pallas import tpu as pltpu

# ----------------------------- hyper-parameters ------------------------------
B        = 2                  # batch
C_IN     = 8                  # input image channels
IMG_H    = 8
IMG_W    = 8
K_SPAT   = IMG_H * IMG_W      # flattened spatial positions of the conv feature map
C_CONV   = 64                 # convnet output channels
R_MAX    = 6                  # encoder.max_role_count
R_PAD    = 8                  # roles padded to the sublane tile (dense vregs/stores)
EMB      = 32                 # verb / role embedding dim
D_HID    = 128                # baseline hidden-rep dim (neighbour-attention model dim)
Q_DIM    = 128                # updated_query_composer output dim
H_ATT    = 128                # v_att hidden dim
M_MFB    = 128                # q_net / v_net output dim (MFB dim, MFB pool factor == 1)
N_LABELS = 256                # classifier output dim
N_VERBS  = 20
N_ROLES  = 30

F32  = jnp.float32
BF16 = jnp.bfloat16
VMEM = pl.BlockSpec(memory_space=pltpu.MemorySpace.VMEM)   # whole array -> VMEM

# bias-slab segment offsets (all 128-aligned, so in-kernel lane slices are tile aligned)
BO_BASE  = 0        # b_base              (128)
BO_CONV  = 128      # b_conv              (64, padded to 128)
BO_QKV   = 256      # bq || bk || bv      (384)
BO_O     = 640      # bo                  (128)
BO_QC    = 768      # b_qc                (128)
BO_VPROJ = 896      # b_vproj             (128)
BO_QPQN  = 1024     # b_qproj || b_qnet   (256)
BO_WATT  = 1280     # v_att linear vector (128)
BO_VNET  = 1408     # b_vnet              (128)
BO_CLS   = 1536     # b_cls               (256)
BIAS_TOTAL = 1792


# ------------------------------ fused kernel ----------------------------------
def fused_forward_kernel(x_ref, rv_ref, pooled_ref,
                         w8_ref, w128_ref, w64_ref, b_ref, o_ref):
    # x_ref:      (B*K, C_IN)        bf16  channels-last image pixels
    # rv_ref:     (B*R_PAD, 2*EMB)   bf16  [verb || role] embeddings per role
    # pooled_ref: (B, C_IN)          bf16  spatially pooled input (baseline stand-in)
    # w8_ref:     (C_IN, 192)        bf16  [w_base(128) | w_conv(64)]
    # w128_ref:   (128, 1152)        bf16  [wq|wk|wv|wo|w_qc_ctx|w_qproj|w_qnet|w_cls(256)]
    # w64_ref:    (64, 384)          bf16  [w_qc_rv | w_vproj | w_vnet]
    # b_ref:      (1, 1792)          f32   bias slab (see BO_* offsets)
    # o_ref:      (B*R_PAD, N_LABELS) f32
    br = rv_ref.shape[0]
    bsz = br // R_PAD
    k_spat = x_ref.shape[0] // bsz

    # ---- baseline_model.forward_hiddenrep (stand-in): pooled FC + ReLU ----
    base = jnp.dot(pooled_ref[...], w8_ref[:, 0:D_HID],
                   preferred_element_type=F32) + b_ref[:, BO_BASE:BO_BASE + D_HID]
    base = jnp.maximum(base, 0.0)                                   # (B, D_HID) f32

    # ---- convnet: 1x1 conv == per-pixel channel matmul ----
    img2 = jnp.dot(x_ref[...], w8_ref[:, D_HID:D_HID + C_CONV],
                   preferred_element_type=F32) + b_ref[:, BO_CONV:BO_CONV + C_CONV]
    img3 = img2.reshape(bsz, k_spat, C_CONV)                        # (B, K, C_CONV) f32
    img3_bf = img3.astype(BF16)

    # ---- neighbour attention over roles (qkv fused into one matmul, M = B*R) ----
    cur = jnp.broadcast_to(base[:, None, :], (bsz, R_PAD, D_HID)).reshape(br, D_HID)
    qkv = jnp.dot(cur.astype(BF16), w128_ref[:, 0:3 * D_HID],
                  preferred_element_type=F32) + b_ref[:, BO_QKV:BO_QKV + 3 * D_HID]
    q = qkv[:, 0:D_HID].reshape(bsz, R_PAD, D_HID)
    k = qkv[:, D_HID:2 * D_HID].reshape(bsz, R_PAD, D_HID)
    v = qkv[:, 2 * D_HID:3 * D_HID].reshape(bsz, R_PAD, D_HID)

    scale = 1.0 / math.sqrt(D_HID)
    scores = jnp.einsum('brd,bsd->brs', q.astype(BF16), k.astype(BF16),
                        preferred_element_type=F32) * scale         # (B, R_PAD, R_PAD)
    row = lax.broadcasted_iota(jnp.int32, (R_PAD, R_PAD), 0)
    col = lax.broadcasted_iota(jnp.int32, (R_PAD, R_PAD), 1)
    # adjacency-no-self mask (stand-in) AND mask of the two padded role columns
    valid = jnp.logical_and(row != col, col < R_MAX)
    scores = jnp.where(valid[None, :, :], scores, -1e9)
    scores = scores - jnp.max(scores, axis=-1, keepdims=True)
    p = jnp.exp(scores)
    p = p * pl.reciprocal(jnp.sum(p, axis=-1, keepdims=True), approx=True)
    ctx = jnp.einsum('brs,bsd->brd', p.astype(BF16), v.astype(BF16),
                     preferred_element_type=F32)                    # (B, R_PAD, D_HID)
    withctx = jnp.dot(ctx.reshape(br, D_HID).astype(BF16),
                      w128_ref[:, 3 * D_HID:4 * D_HID],
                      preferred_element_type=F32) + b_ref[:, BO_O:BO_O + D_HID]

    # ---- updated_query_composer + Dropout_C (identity); concat folded into split matmuls
    upd = jnp.dot(withctx.astype(BF16), w128_ref[:, 4 * D_HID:5 * D_HID],
                  preferred_element_type=F32)
    upd = upd + jnp.dot(rv_ref[...], w64_ref[:, 0:Q_DIM], preferred_element_type=F32)
    upd = jnp.maximum(upd + b_ref[:, BO_QC:BO_QC + Q_DIM], 0.0)     # (B*R, Q_DIM) f32
    upd_bf = upd.astype(BF16)

    # ---- v_att (image side) ----
    v_proj = jnp.maximum(
        jnp.dot(img2.astype(BF16), w64_ref[:, Q_DIM:Q_DIM + H_ATT],
                preferred_element_type=F32) + b_ref[:, BO_VPROJ:BO_VPROJ + H_ATT],
        0.0)                                                        # (B*K, H_ATT)
    v_proj3 = v_proj.reshape(bsz, k_spat, H_ATT).astype(BF16)

    # ---- v_att (query side) fused with q_net into one (B*R, 256) matmul ----
    qpqn = jnp.dot(upd_bf, w128_ref[:, 5 * D_HID:7 * D_HID],
                   preferred_element_type=F32) + b_ref[:, BO_QPQN:BO_QPQN + H_ATT + M_MFB]
    q_proj = jnp.maximum(qpqn[:, 0:H_ATT], 0.0)                     # (B*R, H_ATT)
    q_repr = jnp.maximum(qpqn[:, H_ATT:H_ATT + M_MFB], 0.0)         # (B*R, M_MFB)

    # fold the attention-logit projection vector into the query side; its scalar
    # bias cancels under the max-subtracted softmax and is dropped entirely.
    qw = (q_proj * b_ref[:, BO_WATT:BO_WATT + H_ATT]).reshape(bsz, R_PAD, H_ATT)
    att_logits = jnp.einsum('brh,bkh->brk', qw.astype(BF16), v_proj3,
                            preferred_element_type=F32)             # (B, R_PAD, K)
    att_logits = att_logits - jnp.max(att_logits, axis=-1, keepdims=True)
    att = jnp.exp(att_logits)
    att = att * pl.reciprocal(jnp.sum(att, axis=-1, keepdims=True), approx=True)

    # v_emb = (att * img).sum(spatial) as a single batched contraction on the MXU
    v_emb = jnp.einsum('brk,bkc->brc', att.astype(BF16), img3_bf,
                       preferred_element_type=F32)                  # (B, R_PAD, C_CONV)

    # ---- v_net / MFB / signed sqrt / L2 normalize / classifier ----
    v_repr = jnp.maximum(
        jnp.dot(v_emb.reshape(br, C_CONV).astype(BF16),
                w64_ref[:, Q_DIM + H_ATT:Q_DIM + H_ATT + M_MFB],
                preferred_element_type=F32) + b_ref[:, BO_VNET:BO_VNET + M_MFB],
        0.0)                                                        # (B*R, M_MFB)

    mfb = q_repr * v_repr
    # torch: view(N,1,-1,1) -> sum(dim=3, keepdim) -> squeeze == identity (pool width 1)
    signed = jnp.sqrt(jnp.maximum(mfb, 0.0)) - jnp.sqrt(jnp.maximum(-mfb, 0.0))
    l2 = jnp.sqrt(jnp.sum(signed * signed, axis=-1, keepdims=True))
    normed = signed / jnp.maximum(l2, 1e-12)                        # F.normalize, exact divide
    logits = jnp.dot(normed.astype(BF16),
                     w128_ref[:, 7 * D_HID:7 * D_HID + N_LABELS],
                     preferred_element_type=F32) + b_ref[:, BO_CLS:BO_CLS + N_LABELS]
    o_ref[...] = logits.astype(o_ref.dtype)                         # (B*R_PAD, N_LABELS)


# ------------------------------ parameters ------------------------------------
def init_params(key):
    keys = jax.random.split(key, 24)

    def w(k, shape, scale=0.05):
        return jax.random.normal(k, shape, F32) * scale

    p = {}
    p['w_base'] = w(keys[0], (C_IN, D_HID));      p['b_base'] = w(keys[1], (D_HID,))
    p['w_conv'] = w(keys[2], (C_IN, C_CONV));     p['b_conv'] = w(keys[3], (C_CONV,))
    p['verb_emb'] = w(keys[4], (N_VERBS, EMB), 0.1)
    p['role_emb'] = w(keys[5], (N_ROLES, EMB), 0.1)
    p['wq'] = w(keys[6], (D_HID, D_HID));         p['wk'] = w(keys[7], (D_HID, D_HID))
    p['wv'] = w(keys[8], (D_HID, D_HID));         p['wo'] = w(keys[9], (D_HID, D_HID))
    p['bq'] = w(keys[10], (D_HID,));              p['bk'] = w(keys[11], (D_HID,))
    p['bv'] = w(keys[12], (D_HID,));              p['bo'] = w(keys[13], (D_HID,))
    p['w_qc'] = w(keys[14], (D_HID + 2 * EMB, Q_DIM)); p['b_qc'] = w(keys[15], (Q_DIM,))
    p['w_vproj'] = w(keys[16], (C_CONV, H_ATT));  p['b_vproj'] = w(keys[17], (H_ATT,))
    p['w_qproj'] = w(keys[18], (Q_DIM, H_ATT));   p['b_qproj'] = w(keys[19], (H_ATT,))
    p['w_att'] = w(keys[20], (H_ATT,))            # v_att final linear vector (bias cancels)
    p['w_qnet'] = w(keys[21], (Q_DIM, M_MFB));    p['b_qnet'] = jnp.zeros((M_MFB,), F32)
    p['w_vnet'] = w(keys[22], (C_CONV, M_MFB));   p['b_vnet'] = jnp.zeros((M_MFB,), F32)
    p['w_cls'] = w(keys[23], (M_MFB, N_LABELS));  p['b_cls'] = jnp.zeros((N_LABELS,), F32)
    # encoder stand-in: deterministic verb -> role-id table, padded to R_PAD roles
    p['role_table'] = (jnp.arange(N_VERBS, dtype=jnp.int32)[:, None] * 3
                       + jnp.arange(R_PAD, dtype=jnp.int32)[None, :]) % N_ROLES
    return p


def pack_params(p):
    """Pack ~30 weights/biases into 3 bf16 weight slabs (grouped by contraction
    dim) + 1 f32 bias slab with 128-aligned segments -> 4 input DMAs total."""
    w8 = jnp.concatenate([p['w_base'], p['w_conv']], axis=1)                  # (8, 192)
    w128 = jnp.concatenate([p['wq'], p['wk'], p['wv'], p['wo'],
                            p['w_qc'][:D_HID], p['w_qproj'], p['w_qnet'],
                            p['w_cls']], axis=1)                              # (128, 1152)
    w64 = jnp.concatenate([p['w_qc'][D_HID:], p['w_vproj'], p['w_vnet']],
                          axis=1)                                             # (64, 384)

    def seg(v, width):
        v = v.reshape(1, -1)
        return jnp.pad(v, ((0, 0), (0, width - v.shape[1])))

    bias = jnp.concatenate([
        seg(p['b_base'], 128),
        seg(p['b_conv'], 128),
        seg(jnp.concatenate([p['bq'], p['bk'], p['bv']]), 3 * 128),
        seg(p['bo'], 128),
        seg(p['b_qc'], 128),
        seg(p['b_vproj'], 128),
        seg(jnp.concatenate([p['b_qproj'], p['b_qnet']]), 2 * 128),
        seg(p['w_att'], 128),
        seg(p['b_vnet'], 128),
        seg(p['b_cls'], 256),
    ], axis=1).astype(F32)                                                    # (1, 1792)
    assert bias.shape == (1, BIAS_TOTAL)

    return {'w8': w8.astype(BF16), 'w128': w128.astype(BF16),
            'w64': w64.astype(BF16), 'bias': bias,
            'verb_emb': p['verb_emb'], 'role_emb': p['role_emb'],
            'role_table': p['role_table']}


# ------------------------------ forward ----------------------------------------
def forward(packed, v_org, gt_verb):
    bsz, cin, hh, ww = v_org.shape
    k_spat = hh * ww
    # NCHW -> (B, K, C) channels-last (matches `.view(B, C, HW).permute(0, 2, 1)`)
    x = jnp.transpose(v_org.reshape(bsz, cin, k_spat), (0, 2, 1))
    x2d = x.reshape(bsz * k_spat, cin)
    pooled = jnp.mean(x, axis=1)                                              # (B, C_IN)

    # encoder / embedding lookups (gathers are glue, done once outside the kernel)
    role_idx = packed['role_table'][gt_verb]                                  # (B, R_PAD)
    verb_embd = packed['verb_emb'][gt_verb]                                   # (B, EMB)
    role_embd = packed['role_emb'][role_idx]                                  # (B, R_PAD, EMB)
    verb_exp = jnp.broadcast_to(verb_embd[:, None], (bsz, R_PAD, EMB))
    rv2d = jnp.concatenate([verb_exp, role_embd], -1).reshape(bsz * R_PAD, 2 * EMB)

    logits = pl.pallas_call(
        fused_forward_kernel,
        out_shape=jax.ShapeDtypeStruct((bsz * R_PAD, N_LABELS), F32),
        in_specs=[VMEM] * 7,
        out_specs=VMEM,
    )(x2d.astype(BF16), rv2d.astype(BF16), pooled.astype(BF16),
      packed['w8'], packed['w128'], packed['w64'], packed['bias'])

    # drop the two padding roles -> PyTorch output shape (B, max_role_count, labels)
    return logits.reshape(bsz, R_PAD, N_LABELS)[:, :R_MAX, :]


# ------------------------------ main --------------------------------------------
if __name__ == "__main__":
    params = init_params(jax.random.PRNGKey(0))
    packed = pack_params(params)

    k1, k2 = jax.random.split(jax.random.PRNGKey(0))
    v_org = jax.random.normal(k1, (B, C_IN, IMG_H, IMG_W), F32)               # NCHW like PyTorch
    gt_verb = jax.random.randint(k2, (B,), 0, N_VERBS, dtype=jnp.int32)

    role_label_pred = jax.jit(forward)(packed, v_org, gt_verb)
    jax.block_until_ready(role_label_pred)

    assert role_label_pred.shape == (B, R_MAX, N_LABELS)
    assert bool(jnp.all(jnp.isfinite(role_label_pred)))
    print("KERNEL_OK")
</pallas_src>

<mosaic_0001>
module attributes {stable_mosaic.version = 11 : i64} {
  func.func @fused_forward_kernel(%arg0: memref<128x8xbf16, #tpu.memory_space<vmem>>, %arg1: memref<16x64xbf16, #tpu.memory_space<vmem>>, %arg2: memref<2x8xbf16, #tpu.memory_space<vmem>>, %arg3: memref<8x192xbf16, #tpu.memory_space<vmem>>, %arg4: memref<128x1152xbf16, #tpu.memory_space<vmem>>, %arg5: memref<64x384xbf16, #tpu.memory_space<vmem>>, %arg6: memref<1x1792xf32, #tpu.memory_space<vmem>>, %arg7: memref<16x256xf32, #tpu.memory_space<vmem>>) attributes {dimension_semantics = [], scalar_prefetch = 0 : i64, scratch_operands = 0 : i64, tpu.core_type = #tpu.core_type<tc>} {
    %c0 = arith.constant 0 : index
    %c0_0 = arith.constant 0 : index
    %0 = vector.load %arg2[%c0, %c0_0] : memref<2x8xbf16, #tpu.memory_space<vmem>>, vector<2x8xbf16>
    %c0_1 = arith.constant 0 : index
    %c0_2 = arith.constant 0 : index
    %1 = vector.load %arg3[%c0_1, %c0_2] : memref<8x192xbf16, #tpu.memory_space<vmem>>, vector<8x128xbf16>
    %cst = arith.constant dense<0.000000e+00> : vector<2x128xf32>
    %2 = tpu.matmul %0, %1, %cst {dimension_numbers = #tpu.dot_dimension_numbers<[1], [0], [0], [1], [0, 0, 1, 1], [], []>} : vector<2x8xbf16>, vector<8x128xbf16>, vector<2x128xf32> -> vector<2x128xf32>
    %c0_3 = arith.constant 0 : index
    %c0_4 = arith.constant 0 : index
    %3 = vector.load %arg6[%c0_3, %c0_4] : memref<1x1792xf32, #tpu.memory_space<vmem>>, vector<1x128xf32>
    %4 = vector.broadcast %3 : vector<1x128xf32> to vector<2x128xf32>
    %5 = arith.addf %2, %4 : vector<2x128xf32>
    %cst_5 = arith.constant 0.000000e+00 : f32
    %6 = vector.broadcast %cst_5 : f32 to vector<2x128xf32>
    %7 = arith.maximumf %5, %6 : vector<2x128xf32>
    %c0_6 = arith.constant 0 : index
    %c0_7 = arith.constant 0 : index
    %8 = vector.load %arg0[%c0_6, %c0_7] : memref<128x8xbf16, #tpu.memory_space<vmem>>, vector<128x8xbf16>
    %c0_8 = arith.constant 0 : index
    %c128 = arith.constant 128 : index
    %9 = vector.load %arg3[%c0_8, %c128] : memref<8x192xbf16, #tpu.memory_space<vmem>>, vector<8x64xbf16>
    %cst_9 = arith.constant dense<0.000000e+00> : vector<128x64xf32>
    %10 = tpu.matmul %8, %9, %cst_9 {dimension_numbers = #tpu.dot_dimension_numbers<[1], [0], [0], [1], [0, 0, 1, 1], [], []>} : vector<128x8xbf16>, vector<8x64xbf16>, vector<128x64xf32> -> vector<128x64xf32>
    %c0_10 = arith.constant 0 : index
    %c128_11 = arith.constant 128 : index
    %11 = vector.load %arg6[%c0_10, %c128_11] : memref<1x1792xf32, #tpu.memory_space<vmem>>, vector<1x64xf32>
    %12 = vector.broadcast %11 : vector<1x64xf32> to vector<128x64xf32>
    %13 = arith.addf %10, %12 : vector<128x64xf32>
    %14 = vector.shape_cast %13 : vector<128x64xf32> to vector<2x64x64xf32>
    %15 = arith.truncf %14 : vector<2x64x64xf32> to vector<2x64x64xbf16>
    %16 = vector.shape_cast %7 : vector<2x128xf32> to vector<2x1x128xf32>
    %17 = vector.shape_cast %16 : vector<2x1x128xf32> to vector<2x1x128xf32>
    %18 = vector.broadcast %17 : vector<2x1x128xf32> to vector<2x8x128xf32>
    %19 = vector.shape_cast %18 : vector<2x8x128xf32> to vector<16x128xf32>
    %20 = arith.truncf %19 : vector<16x128xf32> to vector<16x128xbf16>
    %c0_12 = arith.constant 0 : index
    %c0_13 = arith.constant 0 : index
    %21 = vector.load %arg4[%c0_12, %c0_13] : memref<128x1152xbf16, #tpu.memory_space<vmem>>, vector<128x384xbf16>
    %cst_14 = arith.constant dense<0.000000e+00> : vector<16x384xf32>
    %22 = tpu.matmul %20, %21, %cst_14 {dimension_numbers = #tpu.dot_dimension_numbers<[1], [0], [0], [1], [0, 0, 1, 1], [], []>} : vector<16x128xbf16>, vector<128x384xbf16>, vector<16x384xf32> -> vector<16x384xf32>
    %c0_15 = arith.constant 0 : index
    %c256 = arith.constant 256 : index
    %23 = vector.load %arg6[%c0_15, %c256] : memref<1x1792xf32, #tpu.memory_space<vmem>>, vector<1x384xf32>
    %24 = vector.broadcast %23 : vector<1x384xf32> to vector<16x384xf32>
    %25 = arith.addf %22, %24 : vector<16x384xf32>
    %26 = vector.extract_strided_slice %25 {offsets = [0, 0], sizes = [16, 128], strides = [1, 1]} : vector<16x384xf32> to vector<16x128xf32>
    %27 = vector.shape_cast %26 : vector<16x128xf32> to vector<2x8x128xf32>
    %28 = vector.extract_strided_slice %25 {offsets = [0, 128], sizes = [16, 128], strides = [1, 1]} : vector<16x384xf32> to vector<16x128xf32>
    %29 = vector.shape_cast %28 : vector<16x128xf32> to vector<2x8x128xf32>
    %30 = vector.extract_strided_slice %25 {offsets = [0, 256], sizes = [16, 128], strides = [1, 1]} : vector<16x384xf32> to vector<16x128xf32>
    %31 = vector.shape_cast %30 : vector<16x128xf32> to vector<2x8x128xf32>
    %32 = arith.truncf %27 : vector<2x8x128xf32> to vector<2x8x128xbf16>
    %33 = arith.truncf %29 : vector<2x8x128xf32> to vector<2x8x128xbf16>
    "tpu.trace_start"() <{level = 10 : i32, message = "brd,bsd->brs"}> : () -> ()
    %cst_16 = arith.constant dense<0.000000e+00> : vector<2x8x8xf32>
    %34 = tpu.matmul %32, %33, %cst_16 {dimension_numbers = #tpu.dot_dimension_numbers<[2], [2], [1], [1], [0, 0, 0, 1, 1, 1], [0], [0]>} : vector<2x8x128xbf16>, vector<2x8x128xbf16>, vector<2x8x8xf32> -> vector<2x8x8xf32>
    "tpu.trace_stop"() : () -> ()
    %cst_17 = arith.constant 0.0883883461 : f32
    %35 = vector.broadcast %cst_17 : f32 to vector<2x8x8xf32>
    %36 = arith.mulf %34, %35 : vector<2x8x8xf32>
    %37 = tpu.iota {dimensions = array<i32: 0>} : vector<8x8xi32>
    %38 = tpu.iota {dimensions = array<i32: 1>} : vector<8x8xi32>
    %39 = arith.cmpi ne, %37, %38 : vector<8x8xi32>
    %c6_i32 = arith.constant 6 : i32
    %40 = vector.broadcast %c6_i32 : i32 to vector<8x8xi32>
    %41 = arith.cmpi slt, %38, %40 : vector<8x8xi32>
    %42 = arith.andi %39, %41 : vector<8x8xi1>
    %43 = vector.shape_cast %42 : vector<8x8xi1> to vector<1x8x8xi1>
    %cst_18 = arith.constant -1.000000e+09 : f32
    %44 = vector.shape_cast %43 : vector<1x8x8xi1> to vector<1x8x8xi1>
    %45 = vector.broadcast %44 : vector<1x8x8xi1> to vector<2x8x8xi1>
    %46 = vector.broadcast %cst_18 : f32 to vector<2x8x8xf32>
    %47 = arith.select %45, %36, %46 : vector<2x8x8xi1>, vector<2x8x8xf32>
    %cst_19 = arith.constant dense<0xFF800000> : vector<2x8xf32>
    %48 = vector.multi_reduction <maximumf>, %47, %cst_19 [2] : vector<2x8x8xf32> to vector<2x8xf32>
    %49 = vector.shape_cast %48 : vector<2x8xf32> to vector<2x8x1xf32>
    %50 = vector.broadcast %49 : vector<2x8x1xf32> to vector<2x8x8xf32>
    %51 = arith.subf %47, %50 : vector<2x8x8xf32>
    %52 = math.exp %51 : vector<2x8x8xf32>
    %cst_20 = arith.constant dense<0.000000e+00> : vector<2x8xf32>
    %53 = vector.multi_reduction <add>, %52, %cst_20 [2] : vector<2x8x8xf32> to vector<2x8xf32>
    %54 = vector.shape_cast %53 : vector<2x8xf32> to vector<2x8x1xf32>
    %55 = tpu.reciprocal %54 {approx = true} : vector<2x8x1xf32> -> vector<2x8x1xf32>
    %56 = vector.broadcast %55 : vector<2x8x1xf32> to vector<2x8x8xf32>
    %57 = arith.mulf %52, %56 : vector<2x8x8xf32>
    %58 = arith.truncf %57 : vector<2x8x8xf32> to vector<2x8x8xbf16>
    %59 = arith.truncf %31 : vector<2x8x128xf32> to vector<2x8x128xbf16>
    "tpu.trace_start"() <{level = 10 : i32, message = "brs,bsd->brd"}> : () -> ()
    %cst_21 = arith.constant dense<0.000000e+00> : vector<2x8x128xf32>
    %60 = tpu.matmul %58, %59, %cst_21 {dimension_numbers = #tpu.dot_dimension_numbers<[2], [1], [1], [2], [0, 0, 0, 1, 1, 2], [0], [0]>} : vector<2x8x8xbf16>, vector<2x8x128xbf16>, vector<2x8x128xf32> -> vector<2x8x128xf32>
    "tpu.trace_stop"() : () -> ()
    %61 = vector.shape_cast %60 : vector<2x8x128xf32> to vector<16x128xf32>
    %62 = arith.truncf %61 : vector<16x128xf32> to vector<16x128xbf16>
    %c0_22 = arith.constant 0 : index
    %c384 = arith.constant 384 : index
    %63 = vector.load %arg4[%c0_22, %c384] : memref<128x1152xbf16, #tpu.memory_space<vmem>>, vector<128x128xbf16>
    %cst_23 = arith.constant dense<0.000000e+00> : vector<16x128xf32>
    %64 = tpu.matmul %62, %63, %cst_23 {dimension_numbers = #tpu.dot_dimension_numbers<[1], [0], [0], [1], [0, 0, 1, 1], [], []>} : vector<16x128xbf16>, vector<128x128xbf16>, vector<16x128xf32> -> vector<16x128xf32>
    %c0_24 = arith.constant 0 : index
    %c640 = arith.constant 640 : index
    %65 = vector.load %arg6[%c0_24, %c640] : memref<1x1792xf32, #tpu.memory_space<vmem>>, vector<1x128xf32>
    %66 = vector.broadcast %65 : vector<1x128xf32> to vector<16x128xf32>
    %67 = arith.addf %64, %66 : vector<16x128xf32>
    %68 = arith.truncf %67 : vector<16x128xf32> to vector<16x128xbf16>
    %c0_25 = arith.constant 0 : index
    %c512 = arith.constant 512 : index
    %69 = vector.load %arg4[%c0_25, %c512] : memref<128x1152xbf16, #tpu.memory_space<vmem>>, vector<128x128xbf16>
    %cst_26 = arith.constant dense<0.000000e+00> : vector<16x128xf32>
    %70 = tpu.matmul %68, %69, %cst_26 {dimension_numbers = #tpu.dot_dimension_numbers<[1], [0], [0], [1], [0, 0, 1, 1], [], []>} : vector<16x128xbf16>, vector<128x128xbf16>, vector<16x128xf32> -> vector<16x128xf32>
    %c0_27 = arith.constant 0 : index
    %c0_28 = arith.constant 0 : index
    %71 = vector.load %arg1[%c0_27, %c0_28] : memref<16x64xbf16, #tpu.memory_space<vmem>>, vector<16x64xbf16>
    %c0_29 = arith.constant 0 : index
    %c0_30 = arith.constant 0 : index
    %72 = vector.load %arg5[%c0_29, %c0_30] : memref<64x384xbf16, #tpu.memory_space<vmem>>, vector<64x128xbf16>
    %cst_31 = arith.constant dense<0.000000e+00> : vector<16x128xf32>
    %73 = tpu.matmul %71, %72, %cst_31 {dimension_numbers = #tpu.dot_dimension_numbers<[1], [0], [0], [1], [0, 0, 1, 1], [], []>} : vector<16x64xbf16>, vector<64x128xbf16>, vector<16x128xf32> -> vector<16x128xf32>
    %74 = arith.addf %70, %73 : vector<16x128xf32>
    %c0_32 = arith.constant 0 : index
    %c768 = arith.constant 768 : index
    %75 = vector.load %arg6[%c0_32, %c768] : memref<1x1792xf32, #tpu.memory_space<vmem>>, vector<1x128xf32>
    %76 = vector.broadcast %75 : vector<1x128xf32> to vector<16x128xf32>
    %77 = arith.addf %74, %76 : vector<16x128xf32>
    %cst_33 = arith.constant 0.000000e+00 : f32
    %78 = vector.broadcast %cst_33 : f32 to vector<16x128xf32>
    %79 = arith.maximumf %77, %78 : vector<16x128xf32>
    %80 = arith.truncf %79 : vector<16x128xf32> to vector<16x128xbf16>
    %81 = arith.truncf %13 : vector<128x64xf32> to vector<128x64xbf16>
    %c0_34 = arith.constant 0 : index
    %c128_35 = arith.constant 128 : index
    %82 = vector.load %arg5[%c0_34, %c128_35] : memref<64x384xbf16, #tpu.memory_space<vmem>>, vector<64x128xbf16>
    %cst_36 = arith.constant dense<0.000000e+00> : vector<128x128xf32>
    %83 = tpu.matmul %81, %82, %cst_36 {dimension_numbers = #tpu.dot_dimension_numbers<[1], [0], [0], [1], [0, 0, 1, 1], [], []>} : vector<128x64xbf16>, vector<64x128xbf16>, vector<128x128xf32> -> vector<128x128xf32>
    %c0_37 = arith.constant 0 : index
    %c896 = arith.constant 896 : index
    %84 = vector.load %arg6[%c0_37, %c896] : memref<1x1792xf32, #tpu.memory_space<vmem>>, vector<1x128xf32>
    %85 = vector.broadcast %84 : vector<1x128xf32> to vector<128x128xf32>
    %86 = arith.addf %83, %85 : vector<128x128xf32>
    %cst_38 = arith.constant 0.000000e+00 : f32
    %87 = vector.broadcast %cst_38 : f32 to vector<128x128xf32>
    %88 = arith.maximumf %86, %87 : vector<128x128xf32>
    %89 = vector.shape_cast %88 : vector<128x128xf32> to vector<2x64x128xf32>
    %90 = arith.truncf %89 : vector<2x64x128xf32> to vector<2x64x128xbf16>
    %c0_39 = arith.constant 0 : index
    %c640_40 = arith.constant 640 : index
    %91 = vector.load %arg4[%c0_39, %c640_40] : memref<128x1152xbf16, #tpu.memory_space<vmem>>, vector<128x256xbf16>
    %cst_41 = arith.constant dense<0.000000e+00> : vector<16x256xf32>
    %92 = tpu.matmul %80, %91, %cst_41 {dimension_numbers = #tpu.dot_dimension_numbers<[1], [0], [0], [1], [0, 0, 1, 1], [], []>} : vector<16x128xbf16>, vector<128x256xbf16>, vector<16x256xf32> -> vector<16x256xf32>
    %c0_42 = arith.constant 0 : index
    %c1024 = arith.constant 1024 : index
    %93 = vector.load %arg6[%c0_42, %c1024] : memref<1x1792xf32, #tpu.memory_space<vmem>>, vector<1x256xf32>
    %94 = vector.broadcast %93 : vector<1x256xf32> to vector<16x256xf32>
    %95 = arith.addf %92, %94 : vector<16x256xf32>
    %96 = vector.extract_strided_slice %95 {offsets = [0, 0], sizes = [16, 128], strides = [1, 1]} : vector<16x256xf32> to vector<16x128xf32>
    %cst_43 = arith.constant 0.000000e+00 : f32
    %97 = vector.broadcast %cst_43 : f32 to vector<16x128xf32>
    %98 = arith.maximumf %96, %97 : vector<16x128xf32>
    %99 = vector.extract_strided_slice %95 {offsets = [0, 128], sizes = [16, 128], strides = [1, 1]} : vector<16x256xf32> to vector<16x128xf32>
    %cst_44 = arith.constant 0.000000e+00 : f32
    %100 = vector.broadcast %cst_44 : f32 to vector<16x128xf32>
    %101 = arith.maximumf %99, %100 : vector<16x128xf32>
    %c0_45 = arith.constant 0 : index
    %c1280 = arith.constant 1280 : index
    %102 = vector.load %arg6[%c0_45, %c1280] : memref<1x1792xf32, #tpu.memory_space<vmem>>, vector<1x128xf32>
    %103 = vector.broadcast %102 : vector<1x128xf32> to vector<16x128xf32>
    %104 = arith.mulf %98, %103 : vector<16x128xf32>
    %105 = vector.shape_cast %104 : vector<16x128xf32> to vector<2x8x128xf32>
    %106 = arith.truncf %105 : vector<2x8x128xf32> to vector<2x8x128xbf16>
    "tpu.trace_start"() <{level = 10 : i32, message = "brh,bkh->brk"}> : () -> ()
    %cst_46 = arith.constant dense<0.000000e+00> : vector<2x8x64xf32>
    %107 = tpu.matmul %106, %90, %cst_46 {dimension_numbers = #tpu.dot_dimension_numbers<[2], [2], [1], [1], [0, 0, 0, 1, 1, 1], [0], [0]>} : vector<2x8x128xbf16>, vector<2x64x128xbf16>, vector<2x8x64xf32> -> vector<2x8x64xf32>
    "tpu.trace_stop"() : () -> ()
    %cst_47 = arith.constant dense<0xFF800000> : vector<2x8xf32>
    %108 = vector.multi_reduction <maximumf>, %107, %cst_47 [2] : vector<2x8x64xf32> to vector<2x8xf32>
    %109 = vector.shape_cast %108 : vector<2x8xf32> to vector<2x8x1xf32>
    %110 = vector.broadcast %109 : vector<2x8x1xf32> to vector<2x8x64xf32>
    %111 = arith.subf %107, %110 : vector<2x8x64xf32>
    %112 = math.exp %111 : vector<2x8x64xf32>
    %cst_48 = arith.constant dense<0.000000e+00> : vector<2x8xf32>
    %113 = vector.multi_reduction <add>, %112, %cst_48 [2] : vector<2x8x64xf32> to vector<2x8xf32>
    %114 = vector.shape_cast %113 : vector<2x8xf32> to vector<2x8x1xf32>
    %115 = tpu.reciprocal %114 {approx = true} : vector<2x8x1xf32> -> vector<2x8x1xf32>
    %116 = vector.broadcast %115 : vector<2x8x1xf32> to vector<2x8x64xf32>
    %117 = arith.mulf %112, %116 : vector<2x8x64xf32>
    %118 = arith.truncf %117 : vector<2x8x64xf32> to vector<2x8x64xbf16>
    "tpu.trace_start"() <{level = 10 : i32, message = "brk,bkc->brc"}> : () -> ()
    %cst_49 = arith.constant dense<0.000000e+00> : vector<2x8x64xf32>
    %119 = tpu.matmul %118, %15, %cst_49 {dimension_numbers = #tpu.dot_dimension_numbers<[2], [1], [1], [2], [0, 0, 0, 1, 1, 2], [0], [0]>} : vector<2x8x64xbf16>, vector<2x64x64xbf16>, vector<2x8x64xf32> -> vector<2x8x64xf32>
    "tpu.trace_stop"() : () -> ()
    %120 = vector.shape_cast %119 : vector<2x8x64xf32> to vector<16x64xf32>
    %121 = arith.truncf %120 : vector<16x64xf32> to vector<16x64xbf16>
    %c0_50 = arith.constant 0 : index
    %c256_51 = arith.constant 256 : index
    %122 = vector.load %arg5[%c0_50, %c256_51] : memref<64x384xbf16, #tpu.memory_space<vmem>>, vector<64x128xbf16>
    %cst_52 = arith.constant dense<0.000000e+00> : vector<16x128xf32>
    %123 = tpu.matmul %121, %122, %cst_52 {dimension_numbers = #tpu.dot_dimension_numbers<[1], [0], [0], [1], [0, 0, 1, 1], [], []>} : vector<16x64xbf16>, vector<64x128xbf16>, vector<16x128xf32> -> vector<16x128xf32>
    %c0_53 = arith.constant 0 : index
    %c1408 = arith.constant 1408 : index
    %124 = vector.load %arg6[%c0_53, %c1408] : memref<1x1792xf32, #tpu.memory_space<vmem>>, vector<1x128xf32>
    %125 = vector.broadcast %124 : vector<1x128xf32> to vector<16x128xf32>
    %126 = arith.addf %123, %125 : vector<16x128xf32>
    %cst_54 = arith.constant 0.000000e+00 : f32
    %127 = vector.broadcast %cst_54 : f32 to vector<16x128xf32>
    %128 = arith.maximumf %126, %127 : vector<16x128xf32>
    %129 = arith.mulf %101, %128 : vector<16x128xf32>
    %cst_55 = arith.constant 0.000000e+00 : f32
    %130 = vector.broadcast %cst_55 : f32 to vector<16x128xf32>
    %131 = arith.maximumf %129, %130 : vector<16x128xf32>
    %132 = math.sqrt %131 : vector<16x128xf32>
    %cst_56 = arith.constant 0.000000e+00 : f32
    %133 = vector.broadcast %cst_56 : f32 to vector<16x128xf32>
    %134 = arith.subf %133, %129 : vector<16x128xf32>
    %cst_57 = arith.constant 0.000000e+00 : f32
    %135 = vector.broadcast %cst_57 : f32 to vector<16x128xf32>
    %136 = arith.maximumf %134, %135 : vector<16x128xf32>
    %137 = math.sqrt %136 : vector<16x128xf32>
    %138 = arith.subf %132, %137 : vector<16x128xf32>
    %139 = arith.mulf %138, %138 : vector<16x128xf32>
    %cst_58 = arith.constant dense<0.000000e+00> : vector<16xf32>
    %140 = vector.multi_reduction <add>, %139, %cst_58 [1] : vector<16x128xf32> to vector<16xf32>
    %141 = vector.shape_cast %140 : vector<16xf32> to vector<16x1xf32>
    %142 = math.sqrt %141 : vector<16x1xf32>
    %cst_59 = arith.constant 9.99999996E-13 : f32
    %143 = vector.broadcast %cst_59 : f32 to vector<16x1xf32>
    %144 = arith.maximumf %142, %143 : vector<16x1xf32>
    %145 = vector.broadcast %144 : vector<16x1xf32> to vector<16x128xf32>
    %146 = arith.divf %138, %145 : vector<16x128xf32>
    %147 = arith.truncf %146 : vector<16x128xf32> to vector<16x128xbf16>
    %c0_60 = arith.constant 0 : index
    %c896_61 = arith.constant 896 : index
    %148 = vector.load %arg4[%c0_60, %c896_61] : memref<128x1152xbf16, #tpu.memory_space<vmem>>, vector<128x256xbf16>
    %cst_62 = arith.constant dense<0.000000e+00> : vector<16x256xf32>
    %149 = tpu.matmul %147, %148, %cst_62 {dimension_numbers = #tpu.dot_dimension_numbers<[1], [0], [0], [1], [0, 0, 1, 1], [], []>} : vector<16x128xbf16>, vector<128x256xbf16>, vector<16x256xf32> -> vector<16x256xf32>
    %c0_63 = arith.constant 0 : index
    %c1536 = arith.constant 1536 : index
    %150 = vector.load %arg6[%c0_63, %c1536] : memref<1x1792xf32, #tpu.memory_space<vmem>>, vector<1x256xf32>
    %151 = vector.broadcast %150 : vector<1x256xf32> to vector<16x256xf32>
    %152 = arith.addf %149, %151 : vector<16x256xf32>
    %c0_64 = arith.constant 0 : index
    %c0_65 = arith.constant 0 : index
    %153 = vector.load %arg7[%c0_64, %c0_65] : memref<16x256xf32, #tpu.memory_space<vmem>>, vector<16x256xf32>
    tpu.vector_store %arg7[%c0_64, %c0_65], %152 {strides = array<i32>} : memref<16x256xf32, #tpu.memory_space<vmem>>, vector<16x256xf32>,
    return
  }
}

</mosaic_0001>

<bundles_post_ra>
// kernel: forward.1
= control target key start
LH: loop header
LB: loop body
LE: loop exit
PB: predicated region body
PF: predicated region fallthrough
CT: control target
= control target key end

     0   :  { %12 = vsyncpa [#allocation3], 0  ;;  %s2563_s24 = smov [#allocation2]   ;;  %s3114_s0 = inlined_call_operand.vmem [shape: bf16[128,8], index: 0, kind: input, shape index: {}]   ;;  %s3115_s1 = inlined_call_operand.vmem [shape: bf16[16,64], index: 1, kind: input, shape index: {}]   ;;  %s3116_s2 = inlined_call_operand.vmem [shape: bf16[2,8], index: 2, kind: input, shape index: {}]   ;;  %s3117_s3 = inlined_call_operand.vmem [shape: bf16[8,192], index: 3, kind: input, shape index: {}]   ;;  %s3118_s4 = inlined_call_operand.vmem [shape: bf16[128,1152], index: 4, kind: input, shape index: {}]   ;;  %s3119_s5 = inlined_call_operand.vmem [shape: bf16[64,384], index: 5, kind: input, shape index: {}]   ;;  %s3120_s6 = inlined_call_operand.hbm [shape: f32[1,1792], index: 6, kind: input, shape index: {}]   ;;  %s3121_s7 = inlined_call_operand.vmem [shape: f32[16,256], index: 7, kind: output, shape index: {}]  }
   0x1   :  { %s31_s25 = sshll.u32 %s2563_s24, 4  ;;  %s2539_s28 = scalar_lea.hbm %s3120_s6, 224  ;;  %s32_s25 = int_to_ptr.vmem [resolvable:$true] %s31_s25 }
   0x2   :  { %p2540_p0 = scmp.ne.s32.totalorder %s3120_s6, %s2539_s28  ;;  %p2543_p1 = scmp.lt.u32.totalorder %s2539_s28, %s3120_s6 }
   0x4   :  { %p2545_p2 = pnand %p2543_p1, %p2540_p0 }
   0x6   :  { %2548 = shalt.err (!%p2545_p2)
}
   0x7   :  { %s2549_s10 = scalar_lea.vmem %s32_s25, 224  ;;  %p2554_p4 = scmp.lt.s32.totalorder %s32_s25, %s32_s25 }
   0x8   :  { %p2550_p3 = scmp.ne.s32.totalorder %s32_s25, %s2549_s10  ;;  %p2555_p5 = scmp.lt.s32.totalorder %s2549_s10, %s2549_s10 }
   0xa   :  { %p2556_p6 = por %p2555_p5, %p2554_p4 }
   0xc   :  { %p2557_p7 = pnand %p2556_p6, %p2550_p3 }
   0xe   :  { %2560 = shalt.err (!%p2557_p7)
}
   0xf   :  { %34 = dma.hbm_to_vmem [thread:$0]  %s3120_s6, 224, %s32_s25, [#allocation3]  }
  0x10   :  { %2561 = dma.done.wait [#allocation3], 224  }
  0x11   :  { %2562 = vsyncadd [#allocation3], 4294967072  ;;  %v2564_v0 = vmov 0.0   ;;  %vm2565_vm0 = vmmov 0   ;;  %vm52_vm1 = vcmask 1043456   ;;  %vm48_vm2 = vcmask 64512  }
  0x12   :  { %2180 = vmatprep.subr.bf16.mxu0 %v2564_v0  ;;  %2182 = vmatprep.mubr.msk.bf16.mxu0 %vm2565_vm0, %v2564_v0  ;;  %v40_v1 = vld [vmem:[%s3117_s3] sm:$0xf]  ;;  %v113_v3 = vld [vmem:[%s3117_s3 + $0x4] sm:$0xf]  ;;  %v2391_v7 = vld [vmem:[%s3114_s0 + $0x8] sm:$0xff]   ;;  %v2566_v38 = vmov 0   ;;  %v297_v41 = vlaneseq }
  0x13   :  { %v39_v2 = vld [vmem:[%s3116_s2] sm:$0x1]  ;;  %v54_v4 = vsel %vm52_vm1, %v40_v1, 0  ;;  %2384 = vmatprep.subr.msk.bf16.mxu1 %vm52_vm1, %v113_v3  ;;  %v186_v5 = vsel %vm52_vm1, %v113_v3, 0  ;;  %v2394_v9 = vld [vmem:[%s3118_s4 + $0x4] ss:$36 sps:$4 sm:$0xff]  }
  0x14   :  { %2181 = vmatpush3.bf16.msra.mxu0 %v54_v4  ;;  %2187 = vmatpush3.bf16.msra.mxu1 %v186_v5  ;;  %v2390_v6 = vld [vmem:[%s3114_s0] sm:$0xff]   ;;  %v2395_v10 = vld [vmem:[%s3118_s4 + $0x8] ss:$36 sps:$4 sm:$0xff]   ;;  %v2399_v13 = vld [vmem:[%s3118_s4 + $0x50] ss:$36 sps:$4 sm:$0xff]   ;;  %v2754_v43 = vshrl.u32 %v297_v41, 7 }
  0x15   :  { %2204 = vmatprep.subr.bf16.mxu1 %v2564_v0  ;;  %2188 = vmatprep.mubr.msk.bf16.mxu1 %vm48_vm2, %v2390_v6  ;;  %v2392_v8 = vld [vmem:[%s3118_s4] ss:$36 sps:$4 sm:$0xff]   ;;  %v2396_v11 = vld [vmem:[%s3118_s4 + $0x48] ss:$36 sps:$4 sm:$0xff]   ;;  %v2400_v14 = vld [vmem:[%s3114_s0 + $0x10] sm:$0xff]   ;;  %vm972_vm6 = vcmask 523264  }
  0x16   :  { %504 = vmatprep.subr.bf16.mxu0 %v2394_v9  ;;  %v2398_v12 = vld [vmem:[%s3118_s4 + $0x4c] ss:$36 sps:$4 sm:$0xff]   ;;  %v2401_v15 = vld [vmem:[%s3114_s0 + $0x18] sm:$0xff]   ;;  %v2409_v21 = vld [vmem:[%s3118_s4 + $0xe0] ss:$36 sps:$4 sm:$0xff]   ;;  %v2762_v3 = vsub.s32 0, %v2754_v43 }
  0x17   :  { %2183 = vmatmul.mubr.msk.bf16.vlgmr.msra.gmra.mrb[0].mxu0 %vm48_vm2, %v39_v2  ;;  %2189 = vmatmul.mubr.msk.bf16.vlgmr.msra.gmra.mrb[0].mxu1 %vm48_vm2, %v2391_v7  ;;  %v2402_v16 = vld [vmem:[%s3118_s4 + $0x90] ss:$36 sps:$4 sm:$0xff]   ;;  %v2405_v18 = vld [vmem:[%s3118_s4 + $0x98] ss:$36 sps:$4 sm:$0xff]   ;;  %v2410_v22 = vld [vmem:[%s3114_s0 + $0x20] sm:$0xff]  }
  0x18   :  { %505 = vmatpush1.bf16.msra.mxu0 %v2392_v8  ;;  %2205 = vmatpush3.bf16.msra.mxu1 %v2395_v10  ;;  %v2404_v17 = vld [vmem:[%s3118_s4 + $0x94] ss:$36 sps:$4 sm:$0xff]   ;;  %v2408_v20 = vld [vmem:[%s3118_s4 + $0xdc] ss:$36 sps:$4 sm:$0xff]   ;;  %v2411_v23 = vld [vmem:[%s3114_s0 + $0x28] sm:$0xff]  }
  0x19   :  { %506 = vmatprep.subr.bf16.mxu0 %v2398_v12  ;;  %2206 = vmatprep.subr.bf16.mxu1 %v2564_v0  ;;  %v2406_v19 = vld [vmem:[%s3118_s4 + $0xd8] ss:$36 sps:$4 sm:$0xff]   ;;  %v2414_v24 = vld [vmem:[%s3118_s4 + $0x124] ss:$36 sps:$4 sm:$0xff]   ;;  %v2418_v27 = vld [vmem:[%s3118_s4 + $0x16c] ss:$36 sps:$4 sm:$0xff]  }
  0x1a   :  { %2192 = vmatprep.mubr.msk.bf16.mxu1 %vm48_vm2, %v2400_v14  ;;  %v2412_v25 = vld [vmem:[%s3118_s4 + $0x120] ss:$36 sps:$4 sm:$0xff]   ;;  %v2415_v26 = vld [vmem:[%s3118_s4 + $0x128] ss:$36 sps:$4 sm:$0xff]   ;;  %v2419_v29 = vld [vmem:[%s3118_s4 + $0x170] ss:$36 sps:$4 sm:$0xff]   ;;  %536 = vmatprep.mubr.bf16.mxu0 %v2566_v38 }
  0x1b   :  { %v2416_v28 = vld [vmem:[%s3118_s4 + $0x168] ss:$36 sps:$4 sm:$0xff]   ;;  %v2420_v30 = vld [vmem:[%s3114_s0 + $0x30] sm:$0xff]   ;;  %v2421_v31 = vld [vmem:[%s3114_s0 + $0x38] sm:$0xff]   ;;  %v2567_v39 = vmov 1966171168  }
  0x1c   :  { %507 = vmatpush1.bf16.msra.mxu0 %v2396_v11  ;;  %2207 = vmatpush3.bf16.msra.mxu1 %v2399_v13  ;;  %v2424_v32 = vld [vmem:[%s3118_s4 + $0x1b4] ss:$36 sps:$4 sm:$0xff]   ;;  %v2428_v35 = vld [vmem:[%s3118_s4 + $0x1fc] ss:$36 sps:$4 sm:$0xff]   ;;  %v295_v40 = vunpack.c.l.s4 %v2567_v39  ;;  %v2783_v39 = vsub.s32 1, %v2754_v43 }
  0x1d   :  { %2208 = vmatprep.subr.bf16.mxu1 %v2564_v0  ;;  %508 = vmatprep.subr.bf16.mxu0 %v2404_v17  ;;  %v2422_v33 = vld [vmem:[%s3118_s4 + $0x1b0] ss:$36 sps:$4 sm:$0xff]   ;;  %v2425_v34 = vld [vmem:[%s3118_s4 + $0x1b8] ss:$36 sps:$4 sm:$0xff]   ;;  %v2429_v37 = vld [vmem:[%s3118_s4 + $0x200] ss:$36 sps:$4 sm:$0xff]  }
  0x1e   :  { %v2426_v36 = vld [vmem:[%s3118_s4 + $0x1f8] ss:$36 sps:$4 sm:$0xff]   ;;  %v296_v42 = vunpack.c.0.s8 %v295_v40  ;;  %v1969_v44 = vld [vmem:[#allocation2] ss:$0 sm:$0xff]  ;;  %v1971_v45 = vld [vmem:[#allocation2 + $0x1] ss:$0 sm:$0xff] }
  0x1f   :  { %2193 = vmatmul.mubr.msk.bf16.gmra.mrb[4].mxu1 %vm48_vm2, %v2401_v15  ;;  %v359_v40 = vld [vmem:[#allocation2 + $0x2] sm:$0x7] }
  0x20   :  { %509 = vmatpush1.bf16.msra.mxu0 %v2402_v16  ;;  %2209 = vmatpush3.bf16.msra.mxu1 %v2405_v18  ;;  %v299_v49 = vsub.s32 %v296_v42, %v2754_v43  ;;  %v371_v42 = vsub.s32 2, %v2754_v43 }
  0x21   :  { %510 = vmatprep.subr.bf16.mxu0 %v2408_v20  ;;  %2210 = vmatprep.subr.bf16.mxu1 %v2564_v0 }
  0x22   :  { %2196 = vmatprep.mubr.msk.bf16.mxu1 %vm48_vm2, %v2410_v22 }
  0x24   :  { %511 = vmatpush1.bf16.msra.mxu0 %v2406_v19  ;;  %2211 = vmatpush3.bf16.msra.mxu1 %v2409_v21 }
  0x25   :  { %512 = vmatprep.subr.bf16.mxu0 %v2414_v24  ;;  %2212 = vmatprep.subr.bf16.mxu1 %v2564_v0 }
  0x27   :  { %2197 = vmatmul.mubr.msk.bf16.gmra.mrb[8].mxu1 %vm48_vm2, %v2411_v23 }
  0x28   :  { %513 = vmatpush1.bf16.msra.mxu0 %v2412_v25  ;;  %2213 = vmatpush3.bf16.msra.mxu1 %v2415_v26 }
  0x29   :  { %2214 = vmatprep.subr.bf16.mxu1 %v2564_v0  ;;  %514 = vmatprep.subr.bf16.mxu0 %v2418_v27 }
  0x2a   :  { %2200 = vmatprep.mubr.msk.bf16.mxu1 %vm48_vm2, %v2420_v30 }
  0x2c   :  { %515 = vmatpush1.bf16.msra.mxu0 %v2416_v28  ;;  %2215 = vmatpush3.bf16.msra.mxu1 %v2419_v29 }
  0x2d   :  { %2216 = vmatprep.subr.bf16.mxu1 %v2564_v0  ;;  %516 = vmatprep.subr.bf16.mxu0 %v2424_v32 }
  0x2f   :  { %2201 = vmatmul.mubr.msk.bf16.gmra.mrb[12].mxu1 %vm48_vm2, %v2421_v31 }
  0x30   :  { %517 = vmatpush1.bf16.msra.mxu0 %v2422_v33  ;;  %2217 = vmatpush3.bf16.msra.mxu1 %v2425_v34 }
  0x31   :  { %2218 = vmatprep.subr.bf16.mxu1 %v2564_v0  ;;  %2220 = vmatprep.mubr.msk.bf16.mxu1 %vm2565_vm0, %v2564_v0 }
  0x32   :  { %518 = vmatprep.subr.bf16.mxu0 %v2428_v35 }
  0x34   :  { %519 = vmatpush1.bf16.msra.mxu0 %v2426_v36  ;;  %2219 = vmatpush3.bf16.msra.mxu1 %v2429_v37 }
  0x35   :  { %2224 = vmatprep.subr.bf16.mxu0 %v2564_v0  ;;  %2242 = vmatprep.subr.bf16.mxu1 %v2564_v0 }
  0xea   :  { %v90_v46 = vpop.f32.mrb[0].mxu0  ;;  %v2190_v47 = vpop.f32.mrb[0].mxu1 }
  0xeb   :  { %v91_v48 = vadd.f32 %v1969_v44, %v90_v46  ;;  %v2184_v50 = vpop.f32.mrb[1].mxu0  ;;  %v231_v51 = vadd.f32 %v2190_v47, %v1971_v45  ;;  %v222_v52 = vpop.f32.mrb[1].mxu1  ;;  %v368_v44 = vrot.slane %v359_v40, %v2783_v39 }
  0xec   :  { %v93_v53 = vpop.f32.mrb[2].mxu0  ;;  %v223_v54 = vadd.f32 %v1971_v45, %v222_v52  ;;  %v2191_v55 = vpop.f32.mrb[2].mxu1 }
  0xed   :  { %v96_v56 = vmax.f32 %v91_v48, 0.0  ;;  %v2185_v57 = vpop.f32.mrb[3].mxu0  ;;  %v234_v58 = vadd.f32 %v2191_v55, %v1971_v45  ;;  %v225_v59 = vpop.f32.mrb[3].mxu1  ;;  %v372_v48 = vrot.slane %v359_v40, %v371_v42  ;;  %v364_v53 = vrot.slane %v359_v40, %v2762_v3 }
  0xee   :  { %v226_v60 = vadd.f32 %v1971_v45, %v225_v59 }
  0xef   :  { %v300_v61 = vrot.slane %v96_v56, %v299_v49  ;;  %v2757_v62 = vpack.c.bf16 %v234_v58, %v231_v51 }
  0xf0   :  { %v2759_v63 = vpack.c.bf16 %v226_v60, %v223_v54 }
  0xf1   :  { %v301_v1 = vcombine.high %v300_v61, %v300_v61  ;;  %v308_v2 = vrot.slane %v300_v61, %v299_v49 }
  0xf2   :  { %v2194_v4 = vpop.f32.mrb[4].mxu1 }
  0xf3   :  { %v315_v5 = vrot.slane %v301_v1, %v299_v49  ;;  %v247_v6 = vadd.f32 %v2194_v4, %v1971_v45  ;;  %v238_v7 = vpop.f32.mrb[5].mxu1  ;;  %v319_v10 = vrot.slane %v308_v2, %v2762_v3 }
  0xf4   :  { %v239_v8 = vadd.f32 %v1971_v45, %v238_v7  ;;  %v2195_v9 = vpop.f32.mrb[6].mxu1 }
  0xf5   :  { %v323_v11 = vrot.slane %v315_v5, %v2762_v3  ;;  %v250_v12 = vadd.f32 %v2195_v9, %v1971_v45  ;;  %v241_v13 = vpop.f32.mrb[7].mxu1  ;;  %v677_v9 = vand.u32 127, %v297_v41 }
  0xf6   :  { %v242_v14 = vadd.f32 %v1971_v45, %v241_v13 }
  0xf7   :  { %v326_v15 = vpack.c.bf16 %v323_v11, %v319_v10  ;;  %v2766_v16 = vpack.c.bf16 %v250_v12, %v247_v6  ;;  %vm678_vm3 = vcmp.ne.s32.totalorder %v2754_v43, %v677_v9  ;;  %vm679_vm4 = vcmp.lt.s32.totalorder %v677_v9, 6  ;;  %v2452_v9 = vld [vmem:[%s3118_s4 + $0x178] ss:$36 sps:$4 sm:$0xff]  }
  0xf8   :  { %v2768_v17 = vpack.c.bf16 %v242_v14, %v239_v8  ;;  %vm680_vm5 = vmand %vm678_vm3, %vm679_vm4 }
  0xf9   :  { %537 = vmatmul.mubr.bf16.vlgmr.msra.gmra.mrb[4].mxu0 %v326_v15  ;;  %2221 = vmatmul.mubr.bf16.vlgmr.msra.gmra.mrb[16].mxu1 %v326_v15 }
  0xfa   :  { %v2198_v18 = vpop.f32.mrb[8].mxu1  ;;  %2226 = vmatprep.mubr.msk.bf16.mxu0 %vm2565_vm0, %v2564_v0  ;;  %2244 = vmatprep.mubr.msk.bf16.mxu1 %vm2565_vm0, %v2564_v0 }
  0xfb   :  { %v263_v19 = vadd.f32 %v2198_v18, %v1971_v45  ;;  %v254_v20 = vpop.f32.mrb[9].mxu1 }
  0xfc   :  { %v255_v21 = vadd.f32 %v1971_v45, %v254_v20  ;;  %v2199_v22 = vpop.f32.mrb[10].mxu1 }
  0xfd   :  { %v266_v23 = vadd.f32 %v2199_v22, %v1971_v45  ;;  %v257_v24 = vpop.f32.mrb[11].mxu1 }
  0xfe   :  { %v258_v25 = vadd.f32 %v1971_v45, %v257_v24 }
  0xff   :  { %v2774_v26 = vpack.c.bf16 %v266_v23, %v263_v19 }
 0x100   :  { %v2776_v27 = vpack.c.bf16 %v258_v25, %v255_v21 }
 0x102   :  { %v2202_v28 = vpop.f32.mrb[12].mxu1 }
 0x103   :  { %v279_v29 = vadd.f32 %v2202_v28, %v1971_v45  ;;  %v270_v30 = vpop.f32.mrb[13].mxu1 }
 0x104   :  { %v271_v31 = vadd.f32 %v1971_v45, %v270_v30  ;;  %v2203_v32 = vpop.f32.mrb[14].mxu1 }
 0x105   :  { %v282_v33 = vadd.f32 %v2203_v32, %v1971_v45  ;;  %v273_v34 = vpop.f32.mrb[15].mxu1 }
 0x106   :  { %v274_v35 = vadd.f32 %v1971_v45, %v273_v34 }
 0x107   :  { %v2778_v36 = vpack.c.bf16 %v282_v33, %v279_v29 }
 0x108   :  { %v2780_v37 = vpack.c.bf16 %v274_v35, %v271_v31 }
 0x1cc   :  { %v538_v46 = vpop.f32.mrb[4].mxu0  ;;  %v581_v47 = vpop.f32.mrb[16].mxu1 }
 0x1cd   :  { %v540_v49 = vpop.f32.mrb[5].mxu0  ;;  %v2222_v50 = vpop.f32.mrb[17].mxu1  ;;  %v539_v59 = vadd.f32 %v538_v46, %v364_v53  ;;  %v582_v4 = vadd.f32 %v581_v47, %v372_v48  ;;  %v2430_v47 = vld [vmem:[%s3118_s4 + $0xc] ss:$36 sps:$4 sm:$0xff]  }
 0x1ce   :  { %v541_v51 = vadd.f32 %v540_v49, %v368_v44  ;;  %v542_v52 = vpop.f32.mrb[6].mxu0  ;;  %v584_v45 = vpop.f32.mrb[18].mxu1  ;;  %v2431_v49 = vld [vmem:[%s3118_s4 + $0x54] ss:$36 sps:$4 sm:$0xff]  }
 0x1cf   :  { %v585_v54 = vadd.f32 %v584_v45, %v372_v48  ;;  %v544_v55 = vpop.f32.mrb[7].mxu0  ;;  %v2223_v56 = vpop.f32.mrb[19].mxu1  ;;  %v588_v1 = vpack.c.bf16 %v539_v59, %v539_v59  ;;  %v543_v5 = vadd.f32 %v542_v52, %v364_v53  ;;  %v709_v6 = vpack.c.bf16 %v582_v4, %v582_v4  ;;  %v2432_v52 = vld [vmem:[%s3118_s4 + $0x9c] ss:$36 sps:$4 sm:$0xff]   ;;  %v2433_v53 = vld [vmem:[%s3118_s4 + $0xe4] ss:$36 sps:$4 sm:$0xff]  }
 0x1d0   :  { %v590_v57 = vpack.c.bf16 %v541_v51, %v541_v51  ;;  %v545_v61 = vadd.f32 %v544_v55, %v368_v44  ;;  %v2435_v55 = vld [vmem:[%s3118_s4 + $0x174] ss:$36 sps:$4 sm:$0xff]   ;;  %v2436_v56 = vld [vmem:[%s3118_s4 + $0x1bc] ss:$36 sps:$4 sm:$0xff]  }
 0x1d1   :  { %v710_v58 = vpack.c.bf16 %v585_v54, %v585_v54  ;;  %v589_v7 = vpack.c.bf16 %v543_v5, %v543_v5  ;;  %v715_v8 = vsel %vm52_vm1, %v709_v6, 0  ;;  %v2434_v54 = vld [vmem:[%s3118_s4 + $0x12c] ss:$36 sps:$4 sm:$0xff]   ;;  %v2448_v5 = vld [vmem:[%s3118_s4 + $0x58] ss:$36 sps:$4 sm:$0xff]  }
 0x1d2   :  { %2225 = vmatpush3.bf16.xpose.msra.mxu0 %v590_v57  ;;  %v591_v2 = vpack.c.bf16 %v545_v61, %v545_v61  ;;  %v2437_v57 = vld [vmem:[%s3118_s4 + $0x204] ss:$36 sps:$4 sm:$0xff]   ;;  %v2442_v59 = vld [vmem:[%s3119_s5] ss:$12 sps:$4 sm:$0xff]   ;;  %v2444_v61 = vld [vmem:[%s3119_s5 + $0x30] ss:$12 sps:$4 sm:$0xff]  }
 0x1d3   :  { %v761_v60 = vsel %vm52_vm1, %v710_v58, 0  ;;  %2230 = vmatprep.subr.bf16.mxu0 %v2564_v0  ;;  %v2438_v58 = vld [vmem:[%s3119_s5 + $0x4] ss:$12 sps:$4 sm:$0xff]  }
 0x1d4   :  { %2243 = vmatpush3.bf16.msra.mxu1 %v761_v60  ;;  %v2443_v60 = vld [vmem:[%s3119_s5 + $0x18] ss:$12 sps:$4 sm:$0xff]   ;;  %v2447_v4 = vld [vmem:[%s3118_s4 + $0x10] ss:$36 sps:$4 sm:$0xff]  }
 0x1d5   :  { %2268 = vmatprep.subr.bf16.mxu1 %v2564_v0  ;;  %v2449_v6 = vld [vmem:[%s3118_s4 + $0xa0] ss:$36 sps:$4 sm:$0xff]  }
 0x1d9   :  { %2227 = vmatmul.mubr.bf16.vlgmr.msra.gmra.mrb[8].mxu0 %v588_v1  ;;  %v2445_v1 = vld [vmem:[%s3119_s5 + $0x48] ss:$12 sps:$4 sm:$0xff]  }
 0x1da   :  { %2231 = vmatpush3.bf16.xpose.msra.mxu0 %v591_v2  ;;  %2232 = vmatprep.mubr.msk.bf16.mxu0 %vm2565_vm0, %v2564_v0  ;;  %v2446_v2 = vld [vmem:[%s3115_s1] sm:$0xff]  }
 0x1db   :  { %2236 = vmatprep.subr.bf16.mxu0 %v2564_v0 }
 0x1e1   :  { %2233 = vmatmul.mubr.bf16.vlgmr.msra.gmra.mrb[12].mxu0 %v589_v7  ;;  %v2450_v7 = vld [vmem:[%s3118_s4 + $0xe8] ss:$36 sps:$4 sm:$0xff]  }
 0x1e2   :  { %2237 = vmatpush3.bf16.msra.mxu0 %v715_v8  ;;  %2238 = vmatprep.mubr.msk.bf16.mxu0 %vm2565_vm0, %v2564_v0  ;;  %v2451_v8 = vld [vmem:[%s3118_s4 + $0x130] ss:$36 sps:$4 sm:$0xff]  }
 0x1e3   :  { %2248 = vmatprep.subr.bf16.mxu0 %v2564_v0 }
 0x2ac   :  { %v626_v10 = vpop.f32.mrb[8].mxu0 }
 0x2ad   :  { %v672_v11 = vmul.f32 0.088388346, %v626_v10  ;;  %v2228_v12 = vpop.f32.mrb[9].mxu0 }
 0x2ae   :  { %v629_v13 = vpop.f32.mrb[10].mxu0 }
 0x2af   :  { %v2229_v14 = vpop.f32.mrb[11].mxu0  ;;  %v683_v15 = vsel %vm680_vm5, %v672_v11, -1e+09 }
 0x2b0   :  { %v685_v18 = vsel %vm48_vm2, %v683_v15, -inf }
 0x2b1   :  { %686 = vmax.xlane.f32.xlu0 %v685_v18 }
 0x2b4   :  { %v666_v19 = vpop.f32.mrb[12].mxu0 }
 0x2b5   :  { %v673_v20 = vmul.f32 0.088388346, %v666_v19  ;;  %v2234_v21 = vpop.f32.mrb[13].mxu0  ;;  %v2439_v19 = vld [vmem:[%s3119_s5 + $0x1c] ss:$12 sps:$4 sm:$0xff]  }
 0x2b6   :  { %v669_v22 = vpop.f32.mrb[14].mxu0 }
 0x2b7   :  { %v2235_v23 = vpop.f32.mrb[15].mxu0  ;;  %v684_v24 = vsel %vm680_vm5, %v673_v20, -1e+09  ;;  %v2440_v22 = vld [vmem:[%s3119_s5 + $0x34] ss:$12 sps:$4 sm:$0xff]  }
 0x2b8   :  { %v688_v41 = vsel %vm48_vm2, %v684_v24, -inf  ;;  %v2441_v23 = vld [vmem:[%s3119_s5 + $0x4c] ss:$12 sps:$4 sm:$0xff]  }
 0x2b9   :  { %689 = vmax.xlane.f32.xlu0 %v688_v41  ;;  %v2454_v41 = vld [vmem:[%s3118_s4 + $0x208] ss:$36 sps:$4 sm:$0xff]  }
 0x33e   :  { %v687_v43 = vpop.xlane.xlu0 %686 }
 0x33f   :  { %v691_v25 = vsub.f32 %v683_v15, %v687_v43  ;;  %v2455_v43 = vld [vmem:[%s3118_s4 + $0x14] ss:$36 sps:$4 sm:$0xff]  }
 0x341   :  { %v693_v28 = vmul.f32 1.442695, %v691_v25  ;;  %v2457_v25 = vld [vmem:[%s3118_s4 + $0x18] ss:$36 sps:$4 sm:$0xff]  }
 0x343   :  { %2507 = vpow2.f32 %v693_v28  ;;  %v2460_v28 = vld [vmem:[%s3118_s4 + $0x60] ss:$36 sps:$4 sm:$0xff]  }
 0x346   :  { %v690_v29 = vpop.xlane.xlu0 %689 }
 0x347   :  { %v692_v30 = vsub.f32 %v684_v24, %v690_v29  ;;  %v2453_v24 = vld [vmem:[%s3118_s4 + $0x1c0] ss:$36 sps:$4 sm:$0xff]  }
 0x348   :  { %v2458_v29 = vld [vmem:[%s3118_s4 + $0x5c] ss:$36 sps:$4 sm:$0xff]  }
 0x349   :  { %v695_v31 = vmul.f32 1.442695, %v692_v30  ;;  %v2463_v30 = vld [vmem:[%s3118_s4 + $0xa8] ss:$36 sps:$4 sm:$0xff]  }
 0x34b   :  { %2509 = vpow2.f32 %v695_v31 }
 0x34d   :  { %v2508_v32 = vpop.eup %2507 }
 0x34e   :  { %v697_v33 = vsel %vm48_vm2, %v2508_v32, 0.0 }
 0x34f   :  { %698 = vadd.xlane.f32.xlu1 %v697_v33 }
 0x355   :  { %v2510_v34 = vpop.eup %2509 }
 0x356   :  { %v700_v35 = vsel %vm48_vm2, %v2510_v34, 0.0 }
 0x357   :  { %701 = vadd.xlane.f32.xlu1 %v700_v35 }
 0x3dc   :  { %v699_v40 = vpop.xlane.xlu1 %698 }
 0x3dd   :  { %2511 = vrcp.f32 %v699_v40 }
 0x3e4   :  { %v702_v42 = vpop.xlane.xlu1 %701 }
 0x3e5   :  { %2513 = vrcp.f32 %v702_v42  ;;  %v2464_v42 = vld [vmem:[%s3118_s4 + $0xec] ss:$36 sps:$4 sm:$0xff]  }
 0x3e7   :  { %v2512_v44 = vpop.eup %2511 }
 0x3e8   :  { %v705_v46 = vmul.f32 %v2512_v44, %v2508_v32  ;;  %v2461_v32 = vld [vmem:[%s3118_s4 + $0xa4] ss:$36 sps:$4 sm:$0xff]   ;;  %v2469_v44 = vld [vmem:[%s3118_s4 + $0x138] ss:$36 sps:$4 sm:$0xff]  }
 0x3ea   :  { %v707_v48 = vpack.c.bf16 %v705_v46, %v705_v46  ;;  %v2467_v46 = vld [vmem:[%s3118_s4 + $0x134] ss:$36 sps:$4 sm:$0xff]  }
 0x3ec   :  { %2239 = vmatmul.mubr.msk.bf16.vlgmr.msra.gmra.mrb[16].mxu0 %vm48_vm2, %v707_v48  ;;  %v2470_v48 = vld [vmem:[%s3118_s4 + $0x17c] ss:$36 sps:$4 sm:$0xff]  }
 0x3ed   :  { %2249 = vmatpush3.bf16.msra.mxu0 %v2430_v47  ;;  %2264 = vmatprep.mubr.msk.bf16.mxu0 %vm2565_vm0, %v2564_v0  ;;  %v2472_v47 = vld [vmem:[%s3118_s4 + $0x180] ss:$36 sps:$4 sm:$0xff]  }
 0x3ee   :  { %2250 = vmatprep.subr.bf16.mxu0 %v2564_v0 }
 0x3ef   :  { %v2514_v50 = vpop.eup %2513 }
 0x3f0   :  { %v706_v51 = vmul.f32 %v2514_v50, %v2510_v34  ;;  %v2466_v34 = vld [vmem:[%s3118_s4 + $0xf0] ss:$36 sps:$4 sm:$0xff]   ;;  %v2473_v50 = vld [vmem:[%s3118_s4 + $0x1c4] ss:$36 sps:$4 sm:$0xff]  }
 0x3f1   :  { %2251 = vmatpush3.bf16.msra.mxu0 %v2431_v49  ;;  %v2475_v49 = vld [vmem:[%s3118_s4 + $0x1c8] ss:$36 sps:$4 sm:$0xff]  }
 0x3f2   :  { %v708_v45 = vpack.c.bf16 %v706_v51, %v706_v51  ;;  %2252 = vmatprep.subr.bf16.mxu0 %v2564_v0  ;;  %v2014_v51 = vld [vmem:[#allocation2 + $0x5] ss:$0 sm:$0xff] }
 0x3f4   :  { %2245 = vmatmul.mubr.msk.bf16.vlgmr.msra.gmra.mrb[20].mxu1 %vm48_vm2, %v708_v45 }
 0x3f5   :  { %2253 = vmatpush3.bf16.msra.mxu0 %v2432_v52  ;;  %2276 = vmatprep.mubr.msk.bf16.mxu1 %vm2565_vm0, %v2564_v0 }
 0x3f6   :  { %2254 = vmatprep.subr.bf16.mxu0 %v2564_v0  ;;  %2269 = vmatpush3.bf16.msra.mxu1 %v2442_v59 }
 0x3f7   :  { %2270 = vmatprep.subr.bf16.mxu1 %v2564_v0 }
 0x3f9   :  { %2255 = vmatpush3.bf16.msra.mxu0 %v2433_v53 }
 0x3fa   :  { %2256 = vmatprep.subr.bf16.mxu0 %v2564_v0  ;;  %2271 = vmatpush3.bf16.msra.mxu1 %v2443_v60 }
 0x3fb   :  { %2272 = vmatprep.subr.bf16.mxu1 %v2564_v0 }
 0x3fd   :  { %2257 = vmatpush3.bf16.msra.mxu0 %v2434_v54 }
 0x3fe   :  { %2258 = vmatprep.subr.bf16.mxu0 %v2564_v0  ;;  %2273 = vmatpush3.bf16.msra.mxu1 %v2444_v61 }
 0x3ff   :  { %2274 = vmatprep.subr.bf16.mxu1 %v2564_v0 }
 0x401   :  { %2259 = vmatpush3.bf16.msra.mxu0 %v2435_v55 }
 0x402   :  { %2260 = vmatprep.subr.bf16.mxu0 %v2564_v0  ;;  %2275 = vmatpush3.bf16.msra.mxu1 %v2445_v1 }
 0x403   :  { %2280 = vmatprep.subr.bf16.mxu1 %v2564_v0 }
 0x405   :  { %2261 = vmatpush3.bf16.msra.mxu0 %v2436_v56  ;;  %2277 = vmatmul.mubr.msk.bf16.vlgmr.msra.gmra.mrb[24].mxu1 %vm972_vm6, %v2446_v2 }
 0x406   :  { %2262 = vmatprep.subr.bf16.mxu0 %v2564_v0  ;;  %2281 = vmatpush3.bf16.msra.mxu1 %v2447_v4 }
 0x407   :  { %2296 = vmatprep.mubr.msk.bf16.mxu1 %vm2565_vm0, %v2564_v0  ;;  %2282 = vmatprep.subr.bf16.mxu1 %v2564_v0 }
 0x409   :  { %2263 = vmatpush3.bf16.msra.mxu0 %v2437_v57 }
 0x40a   :  { %2300 = vmatprep.subr.bf16.mxu0 %v2438_v58  ;;  %2283 = vmatpush3.bf16.msra.mxu1 %v2448_v5 }
 0x40b   :  { %2284 = vmatprep.subr.bf16.mxu1 %v2564_v0 }
 0x40e   :  { %2285 = vmatpush3.bf16.msra.mxu1 %v2449_v6 }
 0x40f   :  { %2286 = vmatprep.subr.bf16.mxu1 %v2564_v0 }
 0x412   :  { %2287 = vmatpush3.bf16.msra.mxu1 %v2450_v7 }
 0x413   :  { %2288 = vmatprep.subr.bf16.mxu1 %v2564_v0 }
 0x416   :  { %2289 = vmatpush3.bf16.msra.mxu1 %v2451_v8 }
 0x417   :  { %2290 = vmatprep.subr.bf16.mxu1 %v2564_v0 }
 0x41a   :  { %2291 = vmatpush3.bf16.msra.mxu1 %v2452_v9 }
 0x41b   :  { %2292 = vmatprep.subr.bf16.mxu1 %v2564_v0 }
 0x41e   :  { %2293 = vmatpush3.bf16.msra.mxu1 %v2453_v24 }
 0x41f   :  { %2294 = vmatprep.subr.bf16.mxu1 %v2564_v0 }
 0x422   :  { %2295 = vmatpush3.bf16.msra.mxu1 %v2454_v41 }
 0x423   :  { %2324 = vmatprep.subr.bf16.mxu1 %v2564_v0 }
 0x4bf   :  { %v751_v10 = vpop.f32.mrb[16].mxu0 }
 0x4c0   :  { %v2240_v11 = vpop.f32.mrb[17].mxu0 }
 0x4c1   :  { %v754_v12 = vpop.f32.mrb[18].mxu0 }
 0x4c2   :  { %v2241_v13 = vpop.f32.mrb[19].mxu0 }
 0x4c7   :  { %v797_v14 = vpop.f32.mrb[20].mxu1 }
 0x4c8   :  { %v803_v15 = vpack.c.bf16 %v797_v14, %v751_v10  ;;  %v2246_v18 = vpop.f32.mrb[21].mxu1 }
 0x4c9   :  { %v800_v20 = vpop.f32.mrb[22].mxu1 }
 0x4ca   :  { %v2247_v21 = vpop.f32.mrb[23].mxu1  ;;  %2265 = vmatmul.mubr.bf16.vlgmr.msra.gmra.mrb[20].mxu0 %v803_v15 }
 0x4cb   :  { %2301 = vmatpush3.bf16.msra.mxu0 %v2438_v58  ;;  %2308 = vmatprep.mubr.msk.bf16.mxu0 %vm972_vm6, %v2759_v63  ;;  %v2038_v58 = vld [vmem:[#allocation2 + $0x7] ss:$0 sm:$0xff] }
 0x4cc   :  { %2302 = vmatprep.subr.bf16.mxu0 %v2439_v19 }
 0x4cf   :  { %2303 = vmatpush3.bf16.msra.mxu0 %v2439_v19 }
 0x4d0   :  { %2304 = vmatprep.subr.bf16.mxu0 %v2440_v22 }
 0x4d3   :  { %2305 = vmatpush3.bf16.msra.mxu0 %v2440_v22 }
 0x4d4   :  { %2306 = vmatprep.subr.bf16.mxu0 %v2441_v23 }
 0x4d7   :  { %2307 = vmatpush3.bf16.msra.mxu0 %v2441_v23 }
 0x4d8   :  { %1410 = vmatprep.subr.bf16.mxu0 %v2457_v25  ;;  %v2939_v31 = vpop.f32.mrb[24].mxu1 }
 0x4d9   :  { %v2278_v33 = vpop.f32.mrb[25].mxu1 }
 0x4da   :  { %2309 = vmatmul.mubr.msk.bf16.vlgmr.msra.gmra.mrb[24].mxu0 %vm972_vm6, %v2757_v62  ;;  %v2947_v35 = vpop.f32.mrb[26].mxu1 }
 0x4db   :  { %2312 = vmatprep.mubr.msk.bf16.mxu0 %vm972_vm6, %v2768_v17  ;;  %1411 = vmatpush1.bf16.msra.mxu0 %v2455_v43  ;;  %v2279_v40 = vpop.f32.mrb[27].mxu1 }
 0x4dc   :  { %1412 = vmatprep.subr.bf16.mxu0 %v2460_v28 }
 0x4df   :  { %1413 = vmatpush1.bf16.msra.mxu0 %v2458_v29 }
 0x4e0   :  { %1414 = vmatprep.subr.bf16.mxu0 %v2463_v30 }
 0x4e2   :  { %2313 = vmatmul.mubr.msk.bf16.gmra.mrb[28].mxu0 %vm972_vm6, %v2766_v16 }
 0x4e3   :  { %2316 = vmatprep.mubr.msk.bf16.mxu0 %vm972_vm6, %v2776_v27  ;;  %1415 = vmatpush1.bf16.msra.mxu0 %v2461_v32 }
 0x4e4   :  { %1416 = vmatprep.subr.bf16.mxu0 %v2466_v34 }
 0x4e7   :  { %1417 = vmatpush1.bf16.msra.mxu0 %v2464_v42 }
 0x4e8   :  { %1418 = vmatprep.subr.bf16.mxu0 %v2469_v44 }
 0x4ea   :  { %2317 = vmatmul.mubr.msk.bf16.gmra.mrb[32].mxu0 %vm972_vm6, %v2774_v26 }
 0x4eb   :  { %2320 = vmatprep.mubr.msk.bf16.mxu0 %vm972_vm6, %v2780_v37  ;;  %1419 = vmatpush1.bf16.msra.mxu0 %v2467_v46 }
 0x4ec   :  { %1420 = vmatprep.subr.bf16.mxu0 %v2472_v47 }
 0x4ef   :  { %1421 = vmatpush1.bf16.msra.mxu0 %v2470_v48 }
 0x4f0   :  { %1422 = vmatprep.subr.bf16.mxu0 %v2475_v49 }
 0x4f2   :  { %2321 = vmatmul.mubr.msk.bf16.gmra.mrb[36].mxu0 %vm972_vm6, %v2778_v36 }
 0x4f3   :  { %1442 = vmatprep.mubr.bf16.mxu0 %v2566_v38  ;;  %1423 = vmatpush1.bf16.msra.mxu0 %v2473_v50 }
 0x59d   :  { %v909_v52 = vpop.f32.mrb[20].mxu0 }
 0x59e   :  { %v2266_v45 = vpop.f32.mrb[21].mxu0  ;;  %v910_v54 = vadd.f32 %v2014_v51, %v909_v52 }
 0x59f   :  { %v912_v53 = vpop.f32.mrb[22].mxu0 }
 0x5a0   :  { %v913_v55 = vadd.f32 %v2014_v51, %v912_v53  ;;  %v2267_v56 = vpop.f32.mrb[23].mxu0 }
 0x5a2   :  { %v916_v57 = vpack.c.bf16 %v913_v55, %v910_v54 }
 0x5a4   :  { %2297 = vmatmul.mubr.bf16.vlgmr.msra.gmra.mrb[28].mxu1 %v916_v57 }
 0x5a5   :  { %2332 = vmatprep.mubr.msk.bf16.mxu1 %vm2565_vm0, %v2564_v0 }
 0x5ad   :  { %v2310_v59 = vpop.f32.mrb[24].mxu0 }
 0x5ae   :  { %v1224_v60 = vadd.f32 %v2310_v59, %v2038_v58  ;;  %v1215_v61 = vpop.f32.mrb[25].mxu0 }
 0x5af   :  { %v1216_v1 = vadd.f32 %v2038_v58, %v1215_v61  ;;  %v2311_v2 = vpop.f32.mrb[26].mxu0 }
 0x5b0   :  { %v1227_v4 = vadd.f32 %v2311_v2, %v2038_v58  ;;  %v1218_v5 = vpop.f32.mrb[27].mxu0  ;;  %v1280_v7 = vmax.f32 %v1224_v60, 0.0 }
 0x5b1   :  { %v1219_v6 = vadd.f32 %v2038_v58, %v1218_v5  ;;  %v1278_v9 = vmax.f32 %v1216_v1, 0.0 }
 0x5b2   :  { %v1281_v8 = vmax.f32 %v1227_v4, 0.0 }
 0x5b3   :  { %v1279_v10 = vmax.f32 %v1219_v6, 0.0  ;;  %v2478_v6 = vld [vmem:[%s3118_s4 + $0x210] ss:$36 sps:$4 sm:$0xff]  }
 0x5b4   :  { %v1295_v11 = vpack.c.bf16 %v1281_v8, %v1280_v7  ;;  %v2476_v7 = vld [vmem:[%s3118_s4 + $0x20c] ss:$36 sps:$4 sm:$0xff]   ;;  %1424 = vmatprep.subr.bf16.mxu0 %v2478_v6  ;;  %v2037_v8 = vld [vmem:[#allocation2 + $0x6] ss:$0 sm:$0xff] }
 0x5b5   :  { %v1294_v12 = vpack.c.bf16 %v1279_v10, %v1278_v9  ;;  %v2314_v13 = vpop.f32.mrb[28].mxu0  ;;  %1425 = vmatpush1.bf16.msra.mxu0 %v2476_v7 }
 0x5b6   :  { %v1240_v14 = vadd.f32 %v2314_v13, %v2038_v58  ;;  %v1231_v15 = vpop.f32.mrb[29].mxu0  ;;  %2336 = vmatprep.subr.bf16.mxu0 %v2564_v0 }
 0x5b7   :  { %v1232_v18 = vadd.f32 %v2038_v58, %v1231_v15  ;;  %v2315_v19 = vpop.f32.mrb[30].mxu0  ;;  %2325 = vmatpush3.bf16.xpose.msra.mxu1 %v1294_v12 }
 0x5b8   :  { %v1243_v20 = vadd.f32 %v2315_v19, %v2038_v58  ;;  %v1234_v21 = vpop.f32.mrb[31].mxu0  ;;  %2326 = vmatprep.subr.bf16.mxu1 %v2564_v0  ;;  %v1284_v23 = vmax.f32 %v1240_v14, 0.0 }
 0x5b9   :  { %v1235_v22 = vadd.f32 %v2038_v58, %v1234_v21  ;;  %v1282_v41 = vmax.f32 %v1232_v18, 0.0 }
 0x5ba   :  { %v1285_v24 = vmax.f32 %v1243_v20, 0.0 }
 0x5bb   :  { %v1283_v43 = vmax.f32 %v1235_v22, 0.0 }
 0x5bc   :  { %v1297_v25 = vpack.c.bf16 %v1285_v24, %v1284_v23  ;;  %v2067_v24 = vld [vmem:[#allocation2 + $0xa] ss:$0 sm:$0xff] }
 0x5bd   :  { %v1296_v28 = vpack.c.bf16 %v1283_v43, %v1282_v41  ;;  %v2318_v29 = vpop.f32.mrb[32].mxu0 }
 0x5be   :  { %v1256_v30 = vadd.f32 %v2318_v29, %v2038_v58  ;;  %v1247_v32 = vpop.f32.mrb[33].mxu0 }
 0x5bf   :  { %v1248_v33 = vadd.f32 %v2038_v58, %v1247_v32  ;;  %v2319_v34 = vpop.f32.mrb[34].mxu0  ;;  %2327 = vmatpush3.bf16.xpose.msra.mxu1 %v1295_v11 }
 0x5c0   :  { %v1259_v40 = vadd.f32 %v2319_v34, %v2038_v58  ;;  %v1250_v42 = vpop.f32.mrb[35].mxu0  ;;  %2328 = vmatprep.subr.bf16.mxu1 %v2564_v0  ;;  %v1288_v46 = vmax.f32 %v1256_v30, 0.0 }
 0x5c1   :  { %v1251_v44 = vadd.f32 %v2038_v58, %v1250_v42  ;;  %v1286_v48 = vmax.f32 %v1248_v33, 0.0 }
 0x5c2   :  { %v1289_v47 = vmax.f32 %v1259_v40, 0.0 }
 0x5c3   :  { %v1287_v49 = vmax.f32 %v1251_v44, 0.0 }
 0x5c4   :  { %v1299_v50 = vpack.c.bf16 %v1289_v47, %v1288_v46 }
 0x5c5   :  { %v1298_v51 = vpack.c.bf16 %v1287_v49, %v1286_v48  ;;  %v2322_v52 = vpop.f32.mrb[36].mxu0 }
 0x5c6   :  { %v1272_v45 = vadd.f32 %v2322_v52, %v2038_v58  ;;  %v1263_v53 = vpop.f32.mrb[37].mxu0 }
 0x5c7   :  { %v1264_v54 = vadd.f32 %v2038_v58, %v1263_v53  ;;  %v2323_v55 = vpop.f32.mrb[38].mxu0  ;;  %2329 = vmatpush3.bf16.xpose.msra.mxu1 %v1296_v28 }
 0x5c8   :  { %v1275_v56 = vadd.f32 %v2323_v55, %v2038_v58  ;;  %v1266_v57 = vpop.f32.mrb[39].mxu0  ;;  %2330 = vmatprep.subr.bf16.mxu1 %v2564_v0  ;;  %v1292_v60 = vmax.f32 %v1272_v45, 0.0 }
 0x5c9   :  { %v1267_v59 = vadd.f32 %v2038_v58, %v1266_v57  ;;  %v1290_v1 = vmax.f32 %v1264_v54, 0.0 }
 0x5ca   :  { %v1293_v61 = vmax.f32 %v1275_v56, 0.0 }
 0x5cb   :  { %v1291_v2 = vmax.f32 %v1267_v59, 0.0 }
 0x5cc   :  { %v1301_v4 = vpack.c.bf16 %v1293_v61, %v1292_v60 }
 0x5cd   :  { %v1300_v5 = vpack.c.bf16 %v1291_v2, %v1290_v1 }
 0x5cf   :  { %2331 = vmatpush3.bf16.xpose.msra.mxu1 %v1297_v25 }
 0x5d0   :  { %2348 = vmatprep.subr.bf16.mxu1 %v2564_v0 }
 0x677   :  { %v1099_v58 = vpop.f32.mrb[28].mxu1 }
 0x678   :  { %v1100_v9 = vadd.f32 %v1099_v58, %v2939_v31  ;;  %v2298_v10 = vpop.f32.mrb[29].mxu1  ;;  %v2991_v31 = vld [vmem:[#allocation2 + $0x8] sm:$0x3] }
 0x679   :  { %v1102_v11 = vpop.f32.mrb[30].mxu1 }
 0x67a   :  { %v1113_v12 = vadd.f32 %v2037_v8, %v1100_v9  ;;  %v1103_v13 = vadd.f32 %v1102_v11, %v2947_v35  ;;  %v2299_v14 = vpop.f32.mrb[31].mxu1  ;;  %v1323_v35 = vrot.slane %v2991_v31, %v2762_v3 }
 0x67b   :  { %v1327_v14 = vrot.slane %v2991_v31, %v2783_v39 }
 0x67c   :  { %v1114_v15 = vadd.f32 %v2037_v8, %v1103_v13  ;;  %v1115_v18 = vmax.f32 %v1113_v12, 0.0 }
 0x67e   :  { %v1116_v19 = vmax.f32 %v1114_v15, 0.0 }
 0x680   :  { %v1117_v20 = vpack.c.bf16 %v1116_v19, %v1115_v18 }
 0x682   :  { %1443 = vmatmul.mubr.bf16.vlgmr.msra.gmra.mrb[40].mxu0 %v1117_v20 }
 0x683   :  { %2337 = vmatpush3.bf16.xpose.msra.mxu0 %v1298_v51  ;;  %2344 = vmatprep.mubr.msk.bf16.mxu0 %vm2565_vm0, %v2564_v0 }
 0x684   :  { %2338 = vmatprep.subr.bf16.mxu0 %v2564_v0 }
 0x68b   :  { %2339 = vmatpush3.bf16.xpose.msra.mxu0 %v1299_v50 }
 0x68c   :  { %2340 = vmatprep.subr.bf16.mxu0 %v2564_v0 }
 0x693   :  { %2341 = vmatpush3.bf16.xpose.msra.mxu0 %v1300_v5 }
 0x694   :  { %2342 = vmatprep.subr.bf16.mxu0 %v2564_v0 }
 0x69b   :  { %2343 = vmatpush3.bf16.xpose.msra.mxu0 %v1301_v4 }
 0x69c   :  { %2372 = vmatprep.subr.bf16.mxu0 %v2564_v0 }
 0x755   :  { %v1444_v21 = vpop.f32.mrb[40].mxu0 }
 0x756   :  { %v1445_v22 = vadd.f32 %v1444_v21, %v1323_v35  ;;  %v2995_v23 = vpop.f32.mrb[41].mxu0 }
 0x757   :  { %v1448_v41 = vpop.f32.mrb[42].mxu0  ;;  %v1447_v15 = vadd.f32 %v2995_v23, %v1327_v14 }
 0x758   :  { %v1453_v43 = vmax.f32 %v1445_v22, 0.0  ;;  %v1449_v25 = vadd.f32 %v1448_v41, %v1323_v35  ;;  %v2997_v28 = vpop.f32.mrb[43].mxu0 }
 0x759   :  { %v1451_v19 = vadd.f32 %v2997_v28, %v1327_v14  ;;  %v1455_v22 = vmax.f32 %v1447_v15, 0.0 }
 0x75a   :  { %v1464_v29 = vmul.f32 %v2067_v24, %v1453_v43  ;;  %v1454_v30 = vmax.f32 %v1449_v25, 0.0 }
 0x75b   :  { %v1456_v25 = vmax.f32 %v1451_v19, 0.0 }
 0x75c   :  { %v1466_v32 = vpack.c.bf16 %v1464_v29, %v1464_v29  ;;  %v1465_v33 = vmul.f32 %v2067_v24, %v1454_v30 }
 0x75e   :  { %v1467_v34 = vpack.c.bf16 %v1465_v33, %v1465_v33  ;;  %2333 = vmatmul.mubr.bf16.vlgmr.msra.gmra.mrb[32].mxu1 %v1466_v32 }
 0x75f   :  { %2349 = vmatpush3.bf16.msra.mxu1 %v2759_v63  ;;  %2356 = vmatprep.mubr.msk.bf16.mxu1 %vm2565_vm0, %v2564_v0 }
 0x760   :  { %2345 = vmatmul.mubr.bf16.vlgmr.msra.gmra.mrb[44].mxu0 %v1467_v34  ;;  %2350 = vmatprep.subr.bf16.mxu1 %v2564_v0 }
 0x761   :  { %2380 = vmatprep.mubr.msk.bf16.mxu0 %vm2565_vm0, %v2564_v0 }
 0x763   :  { %2351 = vmatpush3.bf16.msra.mxu1 %v2757_v62 }
 0x764   :  { %2352 = vmatprep.subr.bf16.mxu1 %v2564_v0 }
 0x767   :  { %2353 = vmatpush3.bf16.msra.mxu1 %v2768_v17 }
 0x768   :  { %2354 = vmatprep.subr.bf16.mxu1 %v2564_v0 }
 0x76b   :  { %2355 = vmatpush3.bf16.msra.mxu1 %v2766_v16 }
 0x76c   :  { %2360 = vmatprep.subr.bf16.mxu1 %v2564_v0 }
 0x831   :  { %v1502_v63 = vpop.f32.mrb[32].mxu1 }
 0x832   :  { %v2334_v40 = vpop.f32.mrb[33].mxu1  ;;  %v1548_v42 = vsel %vm972_vm6, %v1502_v63, -inf }
 0x833   :  { %v1542_v44 = vpop.f32.mrb[44].mxu0  ;;  %1549 = vmax.xlane.f32.xlu0 %v1548_v42  ;;  %v1505_v46 = vpop.f32.mrb[34].mxu1 }
 0x834   :  { %v2335_v47 = vpop.f32.mrb[35].mxu1  ;;  %v2346_v48 = vpop.f32.mrb[45].mxu0  ;;  %v1551_v62 = vsel %vm972_vm6, %v1542_v44, -inf }
 0x835   :  { %1552 = vmax.xlane.f32.xlu1 %v1551_v62  ;;  %v1545_v49 = vpop.f32.mrb[46].mxu0 }
 0x836   :  { %v2347_v17 = vpop.f32.mrb[47].mxu0 }
 0x8c0   :  { %v1550_v50 = vpop.xlane.xlu0 %1549 }
 0x8c1   :  { %v1554_v51 = vsub.f32 %v1502_v63, %v1550_v50 }
 0x8c2   :  { %v1553_v52 = vpop.xlane.xlu1 %1552 }
 0x8c3   :  { %v1556_v16 = vmul.f32 1.442695, %v1554_v51  ;;  %v1555_v45 = vsub.f32 %v1542_v44, %v1553_v52 }
 0x8c5   :  { %2515 = vpow2.f32 %v1556_v16  ;;  %v1558_v53 = vmul.f32 1.442695, %v1555_v45 }
 0x8c7   :  { %2517 = vpow2.f32 %v1558_v53 }
 0x8cf   :  { %v2516_v54 = vpop.eup %2515 }
 0x8d0   :  { %v1560_v55 = vsel %vm972_vm6, %v2516_v54, 0.0 }
 0x8d1   :  { %v2518_v56 = vpop.eup %2517  ;;  %1561 = vadd.xlane.f32.xlu0 %v1560_v55 }
 0x8d2   :  { %v1563_v57 = vsel %vm972_vm6, %v2518_v56, 0.0 }
 0x8d3   :  { %1564 = vadd.xlane.f32.xlu1 %v1563_v57 }
 0x95e   :  { %v1562_v59 = vpop.xlane.xlu0 %1561 }
 0x95f   :  { %2519 = vrcp.f32 %v1562_v59 }
 0x960   :  { %v1565_v60 = vpop.xlane.xlu1 %1564 }
 0x961   :  { %2521 = vrcp.f32 %v1565_v60 }
 0x969   :  { %v2520_v61 = vpop.eup %2519 }
 0x96a   :  { %v1568_v1 = vmul.f32 %v2520_v61, %v2516_v54 }
 0x96b   :  { %v2522_v4 = vpop.eup %2521 }
 0x96c   :  { %v1570_v2 = vpack.c.bf16 %v1568_v1, %v1568_v1  ;;  %v1569_v5 = vmul.f32 %v2522_v4, %v2518_v56  ;;  %v2485_v4 = vld [vmem:[%s3118_s4 + $0x20] ss:$36 sps:$4 sm:$0xff]  }
 0x96e   :  { %2357 = vmatmul.mubr.msk.bf16.vlgmr.msra.gmra.mrb[36].mxu1 %vm972_vm6, %v1570_v2  ;;  %v1571_v6 = vpack.c.bf16 %v1569_v5, %v1569_v5  ;;  %v2483_v5 = vld [vmem:[%s3118_s4 + $0x1c] ss:$36 sps:$4 sm:$0xff]  }
 0x96f   :  { %2361 = vmatpush3.bf16.msra.mxu1 %v2776_v27  ;;  %2368 = vmatprep.mubr.msk.bf16.mxu1 %vm2565_vm0, %v2564_v0  ;;  %v2479_v27 = vld [vmem:[%s3119_s5 + $0x8] ss:$12 sps:$4 sm:$0xff]  }
 0x970   :  { %2362 = vmatprep.subr.bf16.mxu1 %v2564_v0  ;;  %2373 = vmatpush3.bf16.msra.mxu0 %v2479_v27  ;;  %v2486_v27 = vld [vmem:[%s3118_s4 + $0x64] ss:$36 sps:$4 sm:$0xff]  }
 0x971   :  { %2374 = vmatprep.subr.bf16.mxu0 %v2564_v0 }
 0x973   :  { %2363 = vmatpush3.bf16.msra.mxu1 %v2774_v26  ;;  %v2480_v26 = vld [vmem:[%s3119_s5 + $0x20] ss:$12 sps:$4 sm:$0xff]  }
 0x974   :  { %2364 = vmatprep.subr.bf16.mxu1 %v2564_v0  ;;  %2375 = vmatpush3.bf16.msra.mxu0 %v2480_v26  ;;  %v2491_v26 = vld [vmem:[%s3118_s4 + $0xb0] ss:$36 sps:$4 sm:$0xff]  }
 0x975   :  { %2376 = vmatprep.subr.bf16.mxu0 %v2564_v0 }
 0x977   :  { %2365 = vmatpush3.bf16.msra.mxu1 %v2780_v37 }
 0x978   :  { %2366 = vmatprep.subr.bf16.mxu1 %v2564_v0 }
 0x97b   :  { %2367 = vmatpush3.bf16.msra.mxu1 %v2778_v36  ;;  %v2481_v36 = vld [vmem:[%s3119_s5 + $0x38] ss:$12 sps:$4 sm:$0xff]  }
 0x97c   :  { %2377 = vmatpush3.bf16.msra.mxu0 %v2481_v36  ;;  %1917 = vmatprep.subr.bf16.mxu1 %v2485_v4  ;;  %v2489_v36 = vld [vmem:[%s3118_s4 + $0xac] ss:$36 sps:$4 sm:$0xff]  }
 0x97d   :  { %2378 = vmatprep.subr.bf16.mxu0 %v2564_v0  ;;  %v2070_v0 = vld [vmem:[#allocation2 + $0xb] ss:$0 sm:$0xff] }
 0x97e   :  { %2369 = vmatmul.mubr.msk.bf16.vlgmr.msra.gmra.mrb[40].mxu1 %vm972_vm6, %v1571_v6  ;;  %v2488_v6 = vld [vmem:[%s3118_s4 + $0x68] ss:$36 sps:$4 sm:$0xff]  }
 0x97f   :  { %1949 = vmatprep.mubr.bf16.mxu1 %v2566_v38  ;;  %v2482_v38 = vld [vmem:[%s3119_s5 + $0x50] ss:$12 sps:$4 sm:$0xff]   ;;  %1918 = vmatpush1.bf16.msra.mxu1 %v2483_v5 }
 0x980   :  { %2379 = vmatpush3.bf16.msra.mxu0 %v2482_v38  ;;  %1919 = vmatprep.subr.bf16.mxu1 %v2488_v6  ;;  %v2494_v38 = vld [vmem:[%s3118_s4 + $0xf8] ss:$36 sps:$4 sm:$0xff]  }
 0x983   :  { %1920 = vmatpush1.bf16.msra.mxu1 %v2486_v27 }
 0x984   :  { %1921 = vmatprep.subr.bf16.mxu1 %v2491_v26 }
 0x987   :  { %1922 = vmatpush1.bf16.msra.mxu1 %v2489_v36 }
 0x988   :  { %1923 = vmatprep.subr.bf16.mxu1 %v2494_v38 }
 0xa41   :  { %v1609_v37 = vpop.f32.mrb[36].mxu1 }
 0xa42   :  { %v2358_v7 = vpop.f32.mrb[37].mxu1 }
 0xa43   :  { %v1612_v58 = vpop.f32.mrb[38].mxu1  ;;  %v2497_v7 = vld [vmem:[%s3118_s4 + $0x140] ss:$36 sps:$4 sm:$0xff]  }
 0xa44   :  { %v2359_v8 = vpop.f32.mrb[39].mxu1  ;;  %v2495_v58 = vld [vmem:[%s3118_s4 + $0x13c] ss:$36 sps:$4 sm:$0xff]  }
 0xa45   :  { %v2500_v8 = vld [vmem:[%s3118_s4 + $0x188] ss:$36 sps:$4 sm:$0xff]  }
 0xa51   :  { %v1652_v9 = vpop.f32.mrb[40].mxu1 }
 0xa52   :  { %v1658_v10 = vpack.c.bf16 %v1652_v9, %v1609_v37  ;;  %v2370_v11 = vpop.f32.mrb[41].mxu1  ;;  %v2492_v37 = vld [vmem:[%s3118_s4 + $0xf4] ss:$36 sps:$4 sm:$0xff]   ;;  %v2498_v9 = vld [vmem:[%s3118_s4 + $0x184] ss:$36 sps:$4 sm:$0xff]  }
 0xa53   :  { %v1655_v12 = vpop.f32.mrb[42].mxu1  ;;  %1924 = vmatpush1.bf16.msra.mxu1 %v2492_v37  ;;  %v2501_v11 = vld [vmem:[%s3118_s4 + $0x1cc] ss:$36 sps:$4 sm:$0xff]  }
 0xa54   :  { %v2371_v13 = vpop.f32.mrb[43].mxu1  ;;  %2381 = vmatmul.mubr.msk.bf16.vlgmr.msra.gmra.mrb[48].mxu0 %vm972_vm6, %v1658_v10  ;;  %1925 = vmatprep.subr.bf16.mxu1 %v2497_v7  ;;  %v2503_v10 = vld [vmem:[%s3118_s4 + $0x1d0] ss:$36 sps:$4 sm:$0xff]   ;;  %v2506_v12 = vld [vmem:[%s3118_s4 + $0x218] ss:$36 sps:$4 sm:$0xff]  }
 0xa55   :  { %v2504_v13 = vld [vmem:[%s3118_s4 + $0x214] ss:$36 sps:$4 sm:$0xff]  }
 0xa57   :  { %1926 = vmatpush1.bf16.msra.mxu1 %v2495_v58 }
 0xa58   :  { %1927 = vmatprep.subr.bf16.mxu1 %v2500_v8 }
 0xa5b   :  { %1928 = vmatpush1.bf16.msra.mxu1 %v2498_v9 }
 0xa5c   :  { %1929 = vmatprep.subr.bf16.mxu1 %v2503_v10 }
 0xa5f   :  { %1930 = vmatpush1.bf16.msra.mxu1 %v2501_v11 }
 0xa60   :  { %1931 = vmatprep.subr.bf16.mxu1 %v2506_v12 }
 0xa63   :  { %1932 = vmatpush1.bf16.msra.mxu1 %v2504_v13 }
 0xb27   :  { %v1735_v18 = vpop.f32.mrb[48].mxu0 }
 0xb28   :  { %v1736_v20 = vadd.f32 %v2070_v0, %v1735_v18  ;;  %v2382_v35 = vpop.f32.mrb[49].mxu0 }
 0xb29   :  { %v1738_v21 = vpop.f32.mrb[50].mxu0 }
 0xb2a   :  { %v1742_v24 = vmax.f32 %v1736_v20, 0.0  ;;  %v1739_v41 = vadd.f32 %v2070_v0, %v1738_v21  ;;  %v2383_v43 = vpop.f32.mrb[51].mxu0 }
 0xb2c   :  { %v1744_v29 = vmul.f32 %v1742_v24, %v1455_v22  ;;  %v1743_v30 = vmax.f32 %v1739_v41, 0.0 }
 0xb2e   :  { %v1746_v32 = vmax.f32 %v1744_v29, 0.0  ;;  %v1762_v33 = vsub.f32 0.0, %v1744_v29  ;;  %v1745_v34 = vmul.f32 %v1743_v30, %v1456_v25 }
 0xb30   :  { %v1764_v31 = vmax.f32 %v1762_v33, 0.0  ;;  %v1747_v63 = vmax.f32 %v1745_v34, 0.0  ;;  %v1763_v40 = vsub.f32 0.0, %v1745_v34  ;;  %2523 = vrsqrt.f32 %v1746_v32 }
 0xb31   :  { %vm1750_vm7 = vcmp.eq.f32.partialorder %v1746_v32, inf  ;;  %vm1752_vm8 = vcmp.eq.f32.partialorder %v1746_v32, 0.0  ;;  %v1753_v48 = vand.u32 2147483648, %v1746_v32 }
 0xb32   :  { %v1765_v23 = vmax.f32 %v1763_v40, 0.0  ;;  %2525 = vrsqrt.f32 %v1764_v31  ;;  %vm1768_vm9 = vcmp.eq.f32.partialorder %v1764_v31, inf  ;;  %vm1770_vm10 = vcmp.eq.f32.partialorder %v1764_v31, 0.0 }
 0xb33   :  { %2527 = vrsqrt.f32 %v1747_v63  ;;  %v1771_v17 = vand.u32 2147483648, %v1764_v31  ;;  %vm1757_vm11 = vcmp.eq.f32.partialorder %v1747_v63, inf  ;;  %v1760_v52 = vand.u32 2147483648, %v1747_v63 }
 0xb34   :  { %2529 = vrsqrt.f32 %v1765_v23  ;;  %vm1775_vm12 = vcmp.eq.f32.partialorder %v1765_v23, inf  ;;  %v1778_v55 = vand.u32 2147483648, %v1765_v23  ;;  %vm1759_vm13 = vcmp.eq.f32.partialorder %v1747_v63, 0.0 }
 0xb35   :  { %vm1777_vm14 = vcmp.eq.f32.partialorder %v1765_v23, 0.0 }
 0xb3a   :  { %v2524_v28 = vpop.eup %2523 }
 0xb3b   :  { %v1749_v42 = vmul.f32 %v2524_v28, %v1746_v32 }
 0xb3c   :  { %v2526_v44 = vpop.eup %2525 }
 0xb3d   :  { %v2528_v46 = vpop.eup %2527  ;;  %v1751_v47 = vsel %vm1750_vm7, %v1746_v32, %v1749_v42  ;;  %v1767_v62 = vmul.f32 %v2526_v44, %v1764_v31 }
 0xb3e   :  { %v2530_v49 = vpop.eup %2529  ;;  %v1756_v50 = vmul.f32 %v2528_v46, %v1747_v63  ;;  %v1754_v45 = vsel %vm1752_vm8, %v1753_v48, %v1751_v47 }
 0xb3f   :  { %v1769_v51 = vsel %vm1768_vm9, %v1764_v31, %v1767_v62  ;;  %v1774_v16 = vmul.f32 %v2530_v49, %v1765_v23 }
 0xb40   :  { %v1772_v53 = vsel %vm1770_vm10, %v1771_v17, %v1769_v51  ;;  %v1758_v54 = vsel %vm1757_vm11, %v1747_v63, %v1756_v50  ;;  %v1825_v63 = vld [vmem:[#allocation2 + $0xc] sm:$0x3] }
 0xb41   :  { %v3047_v56 = vsub.f32 %v1754_v45, %v1772_v53  ;;  %v1776_v57 = vsel %vm1775_vm12, %v1765_v23, %v1774_v16  ;;  %v1761_v59 = vsel %vm1759_vm13, %v1760_v52, %v1758_v54  ;;  %v1830_v40 = vrot.slane %v1825_v63, %v2762_v3 }
 0xb42   :  { %v1779_v60 = vsel %vm1777_vm14, %v1778_v55, %v1776_v57  ;;  %v1834_v23 = vrot.slane %v1825_v63, %v2783_v39 }
 0xb43   :  { %v1782_v61 = vmul.f32 %v3047_v56, %v3047_v56  ;;  %v1781_v1 = vsub.f32 %v1761_v59, %v1779_v60 }
 0xb45   :  { %1784 = vadd.xlane.f32.xlu0 %v1782_v61  ;;  %v1783_v2 = vmul.f32 %v1781_v1, %v1781_v1 }
 0xb47   :  { %1786 = vadd.xlane.f32.xlu1 %v1783_v2 }
 0xbd2   :  { %v1785_v14 = vpop.xlane.xlu0 %1784 }
 0xbd3   :  { %2531 = vrsqrt.f32 %v1785_v14  ;;  %vm1790_vm15 = vcmp.eq.f32.partialorder %v1785_v14, inf  ;;  %v1793_v20 = vand.u32 2147483648, %v1785_v14  ;;  %vm1792_vm0 = vcmp.eq.f32.partialorder %v1785_v14, 0.0 }
 0xbd4   :  { %v1787_v0 = vpop.xlane.xlu1 %1786 }
 0xbd5   :  { %2533 = vrsqrt.f32 %v1787_v0  ;;  %vm1797_vm1 = vcmp.eq.f32.partialorder %v1787_v0, inf  ;;  %v1800_v24 = vand.u32 2147483648, %v1787_v0  ;;  %vm1799_vm2 = vcmp.eq.f32.partialorder %v1787_v0, 0.0 }
 0xbdd   :  { %v2532_v15 = vpop.eup %2531 }
 0xbde   :  { %v1789_v18 = vmul.f32 %v2532_v15, %v1785_v14 }
 0xbdf   :  { %v2534_v19 = vpop.eup %2533 }
 0xbe0   :  { %v1791_v35 = vsel %vm1790_vm15, %v1785_v14, %v1789_v18  ;;  %v1796_v21 = vmul.f32 %v2534_v19, %v1787_v0 }
 0xbe1   :  { %v1794_v22 = vsel %vm1792_vm0, %v1793_v20, %v1791_v35 }
 0xbe2   :  { %v1802_v41 = vmax.f32 %v1794_v22, 1e-12  ;;  %v1798_v43 = vsel %vm1797_vm1, %v1787_v0, %v1796_v21 }
 0xbe3   :  { %v1801_v25 = vsel %vm1799_vm2, %v1800_v24, %v1798_v43 }
 0xbe4   :  { %2535 = vrcp.f32 %v1802_v41  ;;  %v1803_v29 = vmax.f32 %v1801_v25, 1e-12 }
 0xbe6   :  { %2537 = vrcp.f32 %v1803_v29 }
 0xbee   :  { %v2536_v30 = vpop.eup %2535 }
 0xbef   :  { %v1805_v33 = vmul.f32 %v2536_v30, %v3047_v56 }
 0xbf0   :  { %v2538_v32 = vpop.eup %2537 }
 0xbf1   :  { %v1807_v34 = vmul.f32 %v2538_v32, %v1781_v1 }
 0xbf3   :  { %v1808_v31 = vpack.c.bf16 %v1807_v34, %v1805_v33 }
 0xbf5   :  { %1950 = vmatmul.mubr.bf16.vlgmr.msra.gmra.mrb[44].mxu1 %v1808_v31 }
 0xcc8   :  { %v1951_v28 = vpop.f32.mrb[44].mxu1 }
 0xcc9   :  { %v1952_v42 = vadd.f32 %v1951_v28, %v1830_v40  ;;  %v1953_v44 = vpop.f32.mrb[45].mxu1 }
 0xcca   :  { %v1954_v46 = vadd.f32 %v1953_v44, %v1834_v23  ;;  %v1955_v47 = vpop.f32.mrb[46].mxu1 }
 0xccb   :  { %1960 = vst [vmem:[%s3121_s7] sm:$0xff] %v1952_v42  ;;  %v1956_v48 = vadd.f32 %v1955_v47, %v1830_v40  ;;  %v1957_v62 = vpop.f32.mrb[47].mxu1 }
 0xccc   :  { %1961 = vst [vmem:[%s3121_s7 + $0x8] sm:$0xff] %v1954_v46  ;;  %v1958_v49 = vadd.f32 %v1957_v62, %v1834_v23 }
 0xccd   :  { %1962 = vst [vmem:[%s3121_s7 + $0x10] sm:$0xff] %v1956_v48 }
 0xcce   :  { %1963 = vst [vmem:[%s3121_s7 + $0x18] sm:$0xff] %v1958_v49 }
 0xccf   :  { %1968 = vsyncpa [#allocation3], 1 }

</bundles_post_ra>
